<compile_context>
chip_gen: v6e
topology: v6e:2x2x1
jax: 0.10.0
libtpu: 0.0.40
codegen_flags: <defaults>
</compile_context>

<pallas_src>
import functools

import jax
import jax.numpy as jnp
from jax import lax
from jax.experimental import pallas as pl
from jax.experimental.pallas import tpu as pltpu


# ---------------------------- fused forward kernel ---------------------------

def _sparse_bilevel_kernel(x_all_ref, ytr_ref, yte_ref,
                           w_enc_ref, b_enc_ref, scal_ref, out_ref,
                           *, n_tr, n_te, num_ways, maxiter_inner,
                           lr, beta1, beta2, eps):
    # ---- encoder: one fused (n_tr+n_te, d_in) @ (d_in, H) matmul + ReLU ----
    feats = jnp.maximum(
        jnp.dot(x_all_ref[...], w_enc_ref[...],
                preferred_element_type=jnp.float32) + b_enc_ref[...], 0.0)
    trX = feats[:n_tr]                                                # (Ntr, H)
    teX = feats[n_tr:]                                                # (Nte, H)

    trY = ytr_ref[...]                                                # (Ntr, K)
    d = trX.shape[1]
    inv_n_tr = 1.0 / n_tr

    # Transposed Adam state: (K, H) = (4, 32) -> a single vreg each.
    Wt = jnp.zeros((num_ways, d), jnp.float32)
    m = jnp.zeros((num_ways, d), jnp.float32)
    v = jnp.zeros((num_ways, d), jnp.float32)

    # logits[n,k] = sum_h trX[n,h] * Wt[k,h]
    dims_logits = (((1,), (1,)), ((), ()))
    # grad[k,h]   = sum_n g_logits[n,k] * trX[n,h]
    dims_grad = (((0,), (0,)), ((), ()))

    # Inner Adam loop on CE(trX @ W, trY), unrolled (maxiter_inner is tiny).
    # Reproduces torch.optim.Adam(lr=0.01, betas=(0.9, 0.999), eps=1e-8).
    for t in range(1, maxiter_inner + 1):
        logits = lax.dot_general(trX, Wt, dims_logits,
                                 preferred_element_type=jnp.float32)  # (Ntr, K)
        # Unstabilized softmax is safe here: W0 = 0, lr = 0.01, 5 steps.
        ez = jnp.exp(logits)
        rowsum = jnp.sum(ez, axis=-1, keepdims=True)
        probs = ez * pl.reciprocal(rowsum, approx=True)
        g_logits = (probs - trY) * inv_n_tr                           # dCE/dlogits
        grad = lax.dot_general(g_logits, trX, dims_grad,
                               preferred_element_type=jnp.float32)    # (K, H)

        m = beta1 * m + (1.0 - beta1) * grad
        v = beta2 * v + (1.0 - beta2) * grad * grad
        bc1 = 1.0 - beta1 ** t                                        # python floats,
        inv_sqrt_bc2 = 1.0 / ((1.0 - beta2 ** t) ** 0.5)              # constant-folded
        step_size = lr / bc1
        denom = jnp.sqrt(v) * inv_sqrt_bc2 + eps
        Wt = Wt - step_size * m / denom                               # exact divide

    # ---- test cross-entropy with adapted (detached) W ----
    teY = yte_ref[...]                                                # (Nte, K)
    te_logits = lax.dot_general(teX, Wt, dims_logits,
                                preferred_element_type=jnp.float32)   # (Nte, K)
    zmax = jnp.max(te_logits, axis=-1, keepdims=True)
    lse = zmax + jnp.log(jnp.sum(jnp.exp(te_logits - zmax), axis=-1, keepdims=True))
    picked = jnp.sum(te_logits * teY, axis=-1, keepdims=True)
    test_loss = jnp.sum(lse - picked, keepdims=True) * (1.0 / n_te)   # (1, 1)

    # column_wise_l1_norm(W) = sum_j ||W[:, j]||_1 = sum(|W|) (layout-invariant)
    l1 = jnp.sum(jnp.abs(Wt), keepdims=True)                          # (1, 1)

    ones11 = jnp.ones((1, 1), jnp.float32)
    scale = jnp.exp(scal_ref[0] * ones11)                             # exp(log_scale)
    lam = jnp.exp(scal_ref[1] * ones11)                               # exp(log_lambda)
    l1_pen = lam * l1
    total = scale * test_loss + l1_pen

    # Pack [total, test_loss, l1_penalty] into one lane-dense (1, 128) row.
    lane = lax.broadcasted_iota(jnp.int32, (1, 128), 1)
    out_ref[...] = (jnp.where(lane == 0, total, 0.0)
                    + jnp.where(lane == 1, test_loss, 0.0)
                    + jnp.where(lane == 2, l1_pen, 0.0))


def sparse_bilevel_forward(train_inputs, train_onehot, test_inputs, test_onehot,
                           w_enc, b_enc, log_scale, log_lambda,
                           *, num_ways, maxiter_inner):
    """Returns (total_loss, test_loss, l1_penalty) scalars."""
    n_tr = train_inputs.shape[0]
    n_te = test_inputs.shape[0]
    d_in, hidden = w_enc.shape

    # Flatten NCHW row-major and stack train/test so the kernel does a single
    # (n_tr+n_te, d_in) @ (d_in, hidden) MXU pass.  Everything stays f32.
    x_all = jnp.concatenate(
        [train_inputs.reshape(n_tr, -1), test_inputs.reshape(n_te, -1)],
        axis=0).astype(jnp.float32)                                   # (Ntr+Nte, d_in)
    b_row = b_enc.reshape(1, hidden).astype(jnp.float32)
    scalars = jnp.stack([jnp.asarray(log_scale, jnp.float32),
                         jnp.asarray(log_lambda, jnp.float32)])       # (2,) -> SMEM

    kern = functools.partial(_sparse_bilevel_kernel,
                             n_tr=n_tr, n_te=n_te, num_ways=num_ways,
                             maxiter_inner=maxiter_inner,
                             lr=0.01, beta1=0.9, beta2=0.999, eps=1e-8)

    out = pl.pallas_call(
        kern,
        out_shape=jax.ShapeDtypeStruct((1, 128), jnp.float32),
        in_specs=[
            pl.BlockSpec(memory_space=pltpu.MemorySpace.VMEM),   # x_all
            pl.BlockSpec(memory_space=pltpu.MemorySpace.VMEM),   # train one-hot
            pl.BlockSpec(memory_space=pltpu.MemorySpace.VMEM),   # test one-hot
            pl.BlockSpec(memory_space=pltpu.MemorySpace.VMEM),   # w_enc
            pl.BlockSpec(memory_space=pltpu.MemorySpace.VMEM),   # b_enc row
            pl.BlockSpec(memory_space=pltpu.MemorySpace.SMEM),   # [log_scale, log_lambda]
        ],
        out_specs=pl.BlockSpec(memory_space=pltpu.MemorySpace.VMEM),
    )(x_all, train_onehot, test_onehot, w_enc.astype(jnp.float32), b_row, scalars)

    return out[0, 0], out[0, 1], out[0, 2]


# ------------------------- pure-JAX reference check --------------------------

def _reference_total(x_tr, y_tr_oh, x_te, y_te_oh, w_enc, b_enc,
                     log_scale, log_lambda, num_ways, maxiter_inner):
    hp = jax.lax.Precision.HIGHEST

    def enc(x):
        xf = x.reshape(x.shape[0], -1)
        return jnp.maximum(jnp.dot(xf, w_enc, precision=hp) + b_enc, 0.0)

    def ce(logits, onehot):
        lse = jax.scipy.special.logsumexp(logits, axis=-1)
        picked = jnp.sum(logits * onehot, axis=-1)
        return jnp.mean(lse - picked)

    trX, teX = enc(x_tr), enc(x_te)
    d = trX.shape[1]
    W = jnp.zeros((d, num_ways), jnp.float32)
    m = jnp.zeros_like(W)
    v = jnp.zeros_like(W)
    lr, b1, b2, eps = 0.01, 0.9, 0.999, 1e-8
    for t in range(1, maxiter_inner + 1):
        logits = jnp.dot(trX, W, precision=hp)
        probs = jax.nn.softmax(logits, axis=-1)
        grad = jnp.dot(trX.T, (probs - y_tr_oh) / trX.shape[0], precision=hp)
        m = b1 * m + (1 - b1) * grad
        v = b2 * v + (1 - b2) * grad * grad
        denom = jnp.sqrt(v) / (1 - b2 ** t) ** 0.5 + eps
        W = W - lr * m / ((1 - b1 ** t) * denom)
    test_loss = ce(jnp.dot(teX, W, precision=hp), y_te_oh)
    l1 = jnp.sum(jnp.abs(W))
    return jnp.exp(log_scale) * test_loss + jnp.exp(log_lambda) * l1


# ----------------------------------- main -------------------------------------

if __name__ == "__main__":
    key = jax.random.PRNGKey(0)
    num_ways, shots_tr, shots_te = 4, 2, 2
    C, H, Wd = 4, 16, 16
    hidden = 32
    maxiter_inner = 5
    n_tr = num_ways * shots_tr
    n_te = num_ways * shots_te

    k1, k2, k3, k4, k5, k6 = jax.random.split(key, 6)
    train_inputs = jax.random.normal(k1, (n_tr, C, H, Wd), jnp.float32)   # NCHW
    test_inputs = jax.random.normal(k2, (n_te, C, H, Wd), jnp.float32)    # NCHW
    train_targets = jax.random.randint(k3, (n_tr,), 0, num_ways)
    test_targets = jax.random.randint(k4, (n_te,), 0, num_ways)

    d_in = C * H * Wd
    w_enc = jax.random.normal(k5, (d_in, hidden), jnp.float32) / jnp.sqrt(d_in)
    b_enc = 0.01 * jax.random.normal(k6, (hidden,), jnp.float32)

    # meta_init(): log_scale = log_lambda = 0.0
    log_scale = jnp.zeros((), jnp.float32)
    log_lambda = jnp.zeros((), jnp.float32)

    train_oh = jax.nn.one_hot(train_targets, num_ways, dtype=jnp.float32)
    test_oh = jax.nn.one_hot(test_targets, num_ways, dtype=jnp.float32)

    total, test_loss, l1_pen = sparse_bilevel_forward(
        train_inputs, train_oh, test_inputs, test_oh, w_enc, b_enc,
        log_scale, log_lambda, num_ways=num_ways, maxiter_inner=maxiter_inner)
    total = jax.block_until_ready(total)

    ref_total = _reference_total(train_inputs, train_oh, test_inputs, test_oh,
                                 w_enc, b_enc, log_scale, log_lambda,
                                 num_ways, maxiter_inner)

    assert bool(jnp.isfinite(total)), "non-finite total loss"
    rel_err = abs(float(total) - float(ref_total)) / max(1.0, abs(float(ref_total)))
    assert rel_err < 5e-2, f"mismatch vs reference: {float(total)} vs {float(ref_total)}"

    print("KERNEL_OK")
</pallas_src>

<mosaic_0001>
module attributes {stable_mosaic.version = 11 : i64} {
  func.func @_sparse_bilevel_kernel(%arg0: memref<16x1024xf32, #tpu.memory_space<vmem>>, %arg1: memref<8x4xf32, #tpu.memory_space<vmem>>, %arg2: memref<8x4xf32, #tpu.memory_space<vmem>>, %arg3: memref<1024x32xf32, #tpu.memory_space<vmem>>, %arg4: memref<1x32xf32, #tpu.memory_space<vmem>>, %arg5: memref<2xf32, #tpu.memory_space<smem>>, %arg6: memref<1x128xf32, #tpu.memory_space<vmem>>) attributes {dimension_semantics = [], scalar_prefetch = 0 : i64, scratch_operands = 0 : i64, tpu.core_type = #tpu.core_type<tc>} {
    %c0 = arith.constant 0 : index
    %c0_0 = arith.constant 0 : index
    %0 = vector.load %arg0[%c0, %c0_0] : memref<16x1024xf32, #tpu.memory_space<vmem>>, vector<16x1024xf32>
    %c0_1 = arith.constant 0 : index
    %c0_2 = arith.constant 0 : index
    %1 = vector.load %arg3[%c0_1, %c0_2] : memref<1024x32xf32, #tpu.memory_space<vmem>>, vector<1024x32xf32>
    %cst = arith.constant dense<0.000000e+00> : vector<16x32xf32>
    %2 = tpu.matmul %0, %1, %cst {dimension_numbers = #tpu.dot_dimension_numbers<[1], [0], [0], [1], [0, 0, 1, 1], [], []>} : vector<16x1024xf32>, vector<1024x32xf32>, vector<16x32xf32> -> vector<16x32xf32>
    %c0_3 = arith.constant 0 : index
    %c0_4 = arith.constant 0 : index
    %3 = vector.load %arg4[%c0_3, %c0_4] : memref<1x32xf32, #tpu.memory_space<vmem>>, vector<1x32xf32>
    %4 = vector.broadcast %3 : vector<1x32xf32> to vector<16x32xf32>
    %5 = arith.addf %2, %4 : vector<16x32xf32>
    %cst_5 = arith.constant 0.000000e+00 : f32
    %6 = vector.broadcast %cst_5 : f32 to vector<16x32xf32>
    %7 = arith.maximumf %5, %6 : vector<16x32xf32>
    %8 = vector.extract_strided_slice %7 {offsets = [0, 0], sizes = [8, 32], strides = [1, 1]} : vector<16x32xf32> to vector<8x32xf32>
    %9 = vector.extract_strided_slice %7 {offsets = [8, 0], sizes = [8, 32], strides = [1, 1]} : vector<16x32xf32> to vector<8x32xf32>
    %c0_6 = arith.constant 0 : index
    %c0_7 = arith.constant 0 : index
    %10 = vector.load %arg1[%c0_6, %c0_7] : memref<8x4xf32, #tpu.memory_space<vmem>>, vector<8x4xf32>
    %cst_8 = arith.constant 0.000000e+00 : f32
    %11 = vector.broadcast %cst_8 : f32 to vector<4x32xf32>
    %cst_9 = arith.constant 0.000000e+00 : f32
    %12 = vector.broadcast %cst_9 : f32 to vector<4x32xf32>
    %cst_10 = arith.constant 0.000000e+00 : f32
    %13 = vector.broadcast %cst_10 : f32 to vector<4x32xf32>
    %cst_11 = arith.constant dense<0.000000e+00> : vector<8x4xf32>
    %14 = tpu.matmul %8, %11, %cst_11 {dimension_numbers = #tpu.dot_dimension_numbers<[1], [1], [0], [0], [0, 0, 1, 0], [], []>} : vector<8x32xf32>, vector<4x32xf32>, vector<8x4xf32> -> vector<8x4xf32>
    %15 = math.exp %14 : vector<8x4xf32>
    %cst_12 = arith.constant dense<0.000000e+00> : vector<8xf32>
    %16 = vector.multi_reduction <add>, %15, %cst_12 [1] : vector<8x4xf32> to vector<8xf32>
    %17 = vector.shape_cast %16 : vector<8xf32> to vector<8x1xf32>
    %18 = tpu.reciprocal %17 {approx = true} : vector<8x1xf32> -> vector<8x1xf32>
    %19 = vector.broadcast %18 : vector<8x1xf32> to vector<8x4xf32>
    %20 = arith.mulf %15, %19 : vector<8x4xf32>
    %21 = arith.subf %20, %10 : vector<8x4xf32>
    %cst_13 = arith.constant 1.250000e-01 : f32
    %22 = vector.broadcast %cst_13 : f32 to vector<8x4xf32>
    %23 = arith.mulf %21, %22 : vector<8x4xf32>
    %cst_14 = arith.constant dense<0.000000e+00> : vector<4x32xf32>
    %24 = tpu.matmul %23, %8, %cst_14 {dimension_numbers = #tpu.dot_dimension_numbers<[0], [0], [1], [1], [0, 1, 1, 1], [], []>} : vector<8x4xf32>, vector<8x32xf32>, vector<4x32xf32> -> vector<4x32xf32>
    %cst_15 = arith.constant 0.899999976 : f32
    %25 = vector.broadcast %cst_15 : f32 to vector<4x32xf32>
    %26 = arith.mulf %25, %12 : vector<4x32xf32>
    %cst_16 = arith.constant 1.000000e-01 : f32
    %27 = vector.broadcast %cst_16 : f32 to vector<4x32xf32>
    %28 = arith.mulf %27, %24 : vector<4x32xf32>
    %29 = arith.addf %26, %28 : vector<4x32xf32>
    %cst_17 = arith.constant 9.990000e-01 : f32
    %30 = vector.broadcast %cst_17 : f32 to vector<4x32xf32>
    %31 = arith.mulf %30, %13 : vector<4x32xf32>
    %cst_18 = arith.constant 1.000000e-03 : f32
    %32 = vector.broadcast %cst_18 : f32 to vector<4x32xf32>
    %33 = arith.mulf %32, %24 : vector<4x32xf32>
    %34 = arith.mulf %33, %24 : vector<4x32xf32>
    %35 = arith.addf %31, %34 : vector<4x32xf32>
    %36 = math.sqrt %35 : vector<4x32xf32>
    %cst_19 = arith.constant 31.622776 : f32
    %37 = vector.broadcast %cst_19 : f32 to vector<4x32xf32>
    %38 = arith.mulf %36, %37 : vector<4x32xf32>
    %cst_20 = arith.constant 9.99999993E-9 : f32
    %39 = vector.broadcast %cst_20 : f32 to vector<4x32xf32>
    %40 = arith.addf %38, %39 : vector<4x32xf32>
    %cst_21 = arith.constant 1.000000e-01 : f32
    %41 = vector.broadcast %cst_21 : f32 to vector<4x32xf32>
    %42 = arith.mulf %41, %29 : vector<4x32xf32>
    %43 = arith.divf %42, %40 : vector<4x32xf32>
    %44 = arith.subf %11, %43 : vector<4x32xf32>
    %cst_22 = arith.constant dense<0.000000e+00> : vector<8x4xf32>
    %45 = tpu.matmul %8, %44, %cst_22 {dimension_numbers = #tpu.dot_dimension_numbers<[1], [1], [0], [0], [0, 0, 1, 0], [], []>} : vector<8x32xf32>, vector<4x32xf32>, vector<8x4xf32> -> vector<8x4xf32>
    %46 = math.exp %45 : vector<8x4xf32>
    %cst_23 = arith.constant dense<0.000000e+00> : vector<8xf32>
    %47 = vector.multi_reduction <add>, %46, %cst_23 [1] : vector<8x4xf32> to vector<8xf32>
    %48 = vector.shape_cast %47 : vector<8xf32> to vector<8x1xf32>
    %49 = tpu.reciprocal %48 {approx = true} : vector<8x1xf32> -> vector<8x1xf32>
    %50 = vector.broadcast %49 : vector<8x1xf32> to vector<8x4xf32>
    %51 = arith.mulf %46, %50 : vector<8x4xf32>
    %52 = arith.subf %51, %10 : vector<8x4xf32>
    %cst_24 = arith.constant 1.250000e-01 : f32
    %53 = vector.broadcast %cst_24 : f32 to vector<8x4xf32>
    %54 = arith.mulf %52, %53 : vector<8x4xf32>
    %cst_25 = arith.constant dense<0.000000e+00> : vector<4x32xf32>
    %55 = tpu.matmul %54, %8, %cst_25 {dimension_numbers = #tpu.dot_dimension_numbers<[0], [0], [1], [1], [0, 1, 1, 1], [], []>} : vector<8x4xf32>, vector<8x32xf32>, vector<4x32xf32> -> vector<4x32xf32>
    %cst_26 = arith.constant 0.899999976 : f32
    %56 = vector.broadcast %cst_26 : f32 to vector<4x32xf32>
    %57 = arith.mulf %56, %29 : vector<4x32xf32>
    %cst_27 = arith.constant 1.000000e-01 : f32
    %58 = vector.broadcast %cst_27 : f32 to vector<4x32xf32>
    %59 = arith.mulf %58, %55 : vector<4x32xf32>
    %60 = arith.addf %57, %59 : vector<4x32xf32>
    %cst_28 = arith.constant 9.990000e-01 : f32
    %61 = vector.broadcast %cst_28 : f32 to vector<4x32xf32>
    %62 = arith.mulf %61, %35 : vector<4x32xf32>
    %cst_29 = arith.constant 1.000000e-03 : f32
    %63 = vector.broadcast %cst_29 : f32 to vector<4x32xf32>
    %64 = arith.mulf %63, %55 : vector<4x32xf32>
    %65 = arith.mulf %64, %55 : vector<4x32xf32>
    %66 = arith.addf %62, %65 : vector<4x32xf32>
    %67 = math.sqrt %66 : vector<4x32xf32>
    %cst_30 = arith.constant 22.366272 : f32
    %68 = vector.broadcast %cst_30 : f32 to vector<4x32xf32>
    %69 = arith.mulf %67, %68 : vector<4x32xf32>
    %cst_31 = arith.constant 9.99999993E-9 : f32
    %70 = vector.broadcast %cst_31 : f32 to vector<4x32xf32>
    %71 = arith.addf %69, %70 : vector<4x32xf32>
    %cst_32 = arith.constant 0.0526315793 : f32
    %72 = vector.broadcast %cst_32 : f32 to vector<4x32xf32>
    %73 = arith.mulf %72, %60 : vector<4x32xf32>
    %74 = arith.divf %73, %71 : vector<4x32xf32>
    %75 = arith.subf %44, %74 : vector<4x32xf32>
    %cst_33 = arith.constant dense<0.000000e+00> : vector<8x4xf32>
    %76 = tpu.matmul %8, %75, %cst_33 {dimension_numbers = #tpu.dot_dimension_numbers<[1], [1], [0], [0], [0, 0, 1, 0], [], []>} : vector<8x32xf32>, vector<4x32xf32>, vector<8x4xf32> -> vector<8x4xf32>
    %77 = math.exp %76 : vector<8x4xf32>
    %cst_34 = arith.constant dense<0.000000e+00> : vector<8xf32>
    %78 = vector.multi_reduction <add>, %77, %cst_34 [1] : vector<8x4xf32> to vector<8xf32>
    %79 = vector.shape_cast %78 : vector<8xf32> to vector<8x1xf32>
    %80 = tpu.reciprocal %79 {approx = true} : vector<8x1xf32> -> vector<8x1xf32>
    %81 = vector.broadcast %80 : vector<8x1xf32> to vector<8x4xf32>
    %82 = arith.mulf %77, %81 : vector<8x4xf32>
    %83 = arith.subf %82, %10 : vector<8x4xf32>
    %cst_35 = arith.constant 1.250000e-01 : f32
    %84 = vector.broadcast %cst_35 : f32 to vector<8x4xf32>
    %85 = arith.mulf %83, %84 : vector<8x4xf32>
    %cst_36 = arith.constant dense<0.000000e+00> : vector<4x32xf32>
    %86 = tpu.matmul %85, %8, %cst_36 {dimension_numbers = #tpu.dot_dimension_numbers<[0], [0], [1], [1], [0, 1, 1, 1], [], []>} : vector<8x4xf32>, vector<8x32xf32>, vector<4x32xf32> -> vector<4x32xf32>
    %cst_37 = arith.constant 0.899999976 : f32
    %87 = vector.broadcast %cst_37 : f32 to vector<4x32xf32>
    %88 = arith.mulf %87, %60 : vector<4x32xf32>
    %cst_38 = arith.constant 1.000000e-01 : f32
    %89 = vector.broadcast %cst_38 : f32 to vector<4x32xf32>
    %90 = arith.mulf %89, %86 : vector<4x32xf32>
    %91 = arith.addf %88, %90 : vector<4x32xf32>
    %cst_39 = arith.constant 9.990000e-01 : f32
    %92 = vector.broadcast %cst_39 : f32 to vector<4x32xf32>
    %93 = arith.mulf %92, %66 : vector<4x32xf32>
    %cst_40 = arith.constant 1.000000e-03 : f32
    %94 = vector.broadcast %cst_40 : f32 to vector<4x32xf32>
    %95 = arith.mulf %94, %86 : vector<4x32xf32>
    %96 = arith.mulf %95, %86 : vector<4x32xf32>
    %97 = arith.addf %93, %96 : vector<4x32xf32>
    %98 = math.sqrt %97 : vector<4x32xf32>
    %cst_41 = arith.constant 18.266552 : f32
    %99 = vector.broadcast %cst_41 : f32 to vector<4x32xf32>
    %100 = arith.mulf %98, %99 : vector<4x32xf32>
    %cst_42 = arith.constant 9.99999993E-9 : f32
    %101 = vector.broadcast %cst_42 : f32 to vector<4x32xf32>
    %102 = arith.addf %100, %101 : vector<4x32xf32>
    %cst_43 = arith.constant 0.0369003676 : f32
    %103 = vector.broadcast %cst_43 : f32 to vector<4x32xf32>
    %104 = arith.mulf %103, %91 : vector<4x32xf32>
    %105 = arith.divf %104, %102 : vector<4x32xf32>
    %106 = arith.subf %75, %105 : vector<4x32xf32>
    %cst_44 = arith.constant dense<0.000000e+00> : vector<8x4xf32>
    %107 = tpu.matmul %8, %106, %cst_44 {dimension_numbers = #tpu.dot_dimension_numbers<[1], [1], [0], [0], [0, 0, 1, 0], [], []>} : vector<8x32xf32>, vector<4x32xf32>, vector<8x4xf32> -> vector<8x4xf32>
    %108 = math.exp %107 : vector<8x4xf32>
    %cst_45 = arith.constant dense<0.000000e+00> : vector<8xf32>
    %109 = vector.multi_reduction <add>, %108, %cst_45 [1] : vector<8x4xf32> to vector<8xf32>
    %110 = vector.shape_cast %109 : vector<8xf32> to vector<8x1xf32>
    %111 = tpu.reciprocal %110 {approx = true} : vector<8x1xf32> -> vector<8x1xf32>
    %112 = vector.broadcast %111 : vector<8x1xf32> to vector<8x4xf32>
    %113 = arith.mulf %108, %112 : vector<8x4xf32>
    %114 = arith.subf %113, %10 : vector<8x4xf32>
    %cst_46 = arith.constant 1.250000e-01 : f32
    %115 = vector.broadcast %cst_46 : f32 to vector<8x4xf32>
    %116 = arith.mulf %114, %115 : vector<8x4xf32>
    %cst_47 = arith.constant dense<0.000000e+00> : vector<4x32xf32>
    %117 = tpu.matmul %116, %8, %cst_47 {dimension_numbers = #tpu.dot_dimension_numbers<[0], [0], [1], [1], [0, 1, 1, 1], [], []>} : vector<8x4xf32>, vector<8x32xf32>, vector<4x32xf32> -> vector<4x32xf32>
    %cst_48 = arith.constant 0.899999976 : f32
    %118 = vector.broadcast %cst_48 : f32 to vector<4x32xf32>
    %119 = arith.mulf %118, %91 : vector<4x32xf32>
    %cst_49 = arith.constant 1.000000e-01 : f32
    %120 = vector.broadcast %cst_49 : f32 to vector<4x32xf32>
    %121 = arith.mulf %120, %117 : vector<4x32xf32>
    %122 = arith.addf %119, %121 : vector<4x32xf32>
    %cst_50 = arith.constant 9.990000e-01 : f32
    %123 = vector.broadcast %cst_50 : f32 to vector<4x32xf32>
    %124 = arith.mulf %123, %97 : vector<4x32xf32>
    %cst_51 = arith.constant 1.000000e-03 : f32
    %125 = vector.broadcast %cst_51 : f32 to vector<4x32xf32>
    %126 = arith.mulf %125, %117 : vector<4x32xf32>
    %127 = arith.mulf %126, %117 : vector<4x32xf32>
    %128 = arith.addf %124, %127 : vector<4x32xf32>
    %129 = math.sqrt %128 : vector<4x32xf32>
    %cst_52 = arith.constant 15.8232527 : f32
    %130 = vector.broadcast %cst_52 : f32 to vector<4x32xf32>
    %131 = arith.mulf %129, %130 : vector<4x32xf32>
    %cst_53 = arith.constant 9.99999993E-9 : f32
    %132 = vector.broadcast %cst_53 : f32 to vector<4x32xf32>
    %133 = arith.addf %131, %132 : vector<4x32xf32>
    %cst_54 = arith.constant 0.0290782209 : f32
    %134 = vector.broadcast %cst_54 : f32 to vector<4x32xf32>
    %135 = arith.mulf %134, %122 : vector<4x32xf32>
    %136 = arith.divf %135, %133 : vector<4x32xf32>
    %137 = arith.subf %106, %136 : vector<4x32xf32>
    %cst_55 = arith.constant dense<0.000000e+00> : vector<8x4xf32>
    %138 = tpu.matmul %8, %137, %cst_55 {dimension_numbers = #tpu.dot_dimension_numbers<[1], [1], [0], [0], [0, 0, 1, 0], [], []>} : vector<8x32xf32>, vector<4x32xf32>, vector<8x4xf32> -> vector<8x4xf32>
    %139 = math.exp %138 : vector<8x4xf32>
    %cst_56 = arith.constant dense<0.000000e+00> : vector<8xf32>
    %140 = vector.multi_reduction <add>, %139, %cst_56 [1] : vector<8x4xf32> to vector<8xf32>
    %141 = vector.shape_cast %140 : vector<8xf32> to vector<8x1xf32>
    %142 = tpu.reciprocal %141 {approx = true} : vector<8x1xf32> -> vector<8x1xf32>
    %143 = vector.broadcast %142 : vector<8x1xf32> to vector<8x4xf32>
    %144 = arith.mulf %139, %143 : vector<8x4xf32>
    %145 = arith.subf %144, %10 : vector<8x4xf32>
    %cst_57 = arith.constant 1.250000e-01 : f32
    %146 = vector.broadcast %cst_57 : f32 to vector<8x4xf32>
    %147 = arith.mulf %145, %146 : vector<8x4xf32>
    %cst_58 = arith.constant dense<0.000000e+00> : vector<4x32xf32>
    %148 = tpu.matmul %147, %8, %cst_58 {dimension_numbers = #tpu.dot_dimension_numbers<[0], [0], [1], [1], [0, 1, 1, 1], [], []>} : vector<8x4xf32>, vector<8x32xf32>, vector<4x32xf32> -> vector<4x32xf32>
    %cst_59 = arith.constant 0.899999976 : f32
    %149 = vector.broadcast %cst_59 : f32 to vector<4x32xf32>
    %150 = arith.mulf %149, %122 : vector<4x32xf32>
    %cst_60 = arith.constant 1.000000e-01 : f32
    %151 = vector.broadcast %cst_60 : f32 to vector<4x32xf32>
    %152 = arith.mulf %151, %148 : vector<4x32xf32>
    %153 = arith.addf %150, %152 : vector<4x32xf32>
    %cst_61 = arith.constant 9.990000e-01 : f32
    %154 = vector.broadcast %cst_61 : f32 to vector<4x32xf32>
    %155 = arith.mulf %154, %128 : vector<4x32xf32>
    %cst_62 = arith.constant 1.000000e-03 : f32
    %156 = vector.broadcast %cst_62 : f32 to vector<4x32xf32>
    %157 = arith.mulf %156, %148 : vector<4x32xf32>
    %158 = arith.mulf %157, %148 : vector<4x32xf32>
    %159 = arith.addf %155, %158 : vector<4x32xf32>
    %160 = math.sqrt %159 : vector<4x32xf32>
    %cst_63 = arith.constant 14.1562853 : f32
    %161 = vector.broadcast %cst_63 : f32 to vector<4x32xf32>
    %162 = arith.mulf %160, %161 : vector<4x32xf32>
    %cst_64 = arith.constant 9.99999993E-9 : f32
    %163 = vector.broadcast %cst_64 : f32 to vector<4x32xf32>
    %164 = arith.addf %162, %163 : vector<4x32xf32>
    %cst_65 = arith.constant 0.0244194288 : f32
    %165 = vector.broadcast %cst_65 : f32 to vector<4x32xf32>
    %166 = arith.mulf %165, %153 : vector<4x32xf32>
    %167 = arith.divf %166, %164 : vector<4x32xf32>
    %168 = arith.subf %137, %167 : vector<4x32xf32>
    %c0_66 = arith.constant 0 : index
    %c0_67 = arith.constant 0 : index
    %169 = vector.load %arg2[%c0_66, %c0_67] : memref<8x4xf32, #tpu.memory_space<vmem>>, vector<8x4xf32>
    %cst_68 = arith.constant dense<0.000000e+00> : vector<8x4xf32>
    %170 = tpu.matmul %9, %168, %cst_68 {dimension_numbers = #tpu.dot_dimension_numbers<[1], [1], [0], [0], [0, 0, 1, 0], [], []>} : vector<8x32xf32>, vector<4x32xf32>, vector<8x4xf32> -> vector<8x4xf32>
    %cst_69 = arith.constant dense<0xFF800000> : vector<8xf32>
    %171 = vector.multi_reduction <maximumf>, %170, %cst_69 [1] : vector<8x4xf32> to vector<8xf32>
    %172 = vector.shape_cast %171 : vector<8xf32> to vector<8x1xf32>
    %173 = vector.broadcast %172 : vector<8x1xf32> to vector<8x4xf32>
    %174 = arith.subf %170, %173 : vector<8x4xf32>
    %175 = math.exp %174 : vector<8x4xf32>
    %cst_70 = arith.constant dense<0.000000e+00> : vector<8xf32>
    %176 = vector.multi_reduction <add>, %175, %cst_70 [1] : vector<8x4xf32> to vector<8xf32>
    %177 = vector.shape_cast %176 : vector<8xf32> to vector<8x1xf32>
    %178 = math.log %177 : vector<8x1xf32>
    %179 = arith.addf %172, %178 : vector<8x1xf32>
    %180 = arith.mulf %170, %169 : vector<8x4xf32>
    %cst_71 = arith.constant dense<0.000000e+00> : vector<8xf32>
    %181 = vector.multi_reduction <add>, %180, %cst_71 [1] : vector<8x4xf32> to vector<8xf32>
    %182 = vector.shape_cast %181 : vector<8xf32> to vector<8x1xf32>
    %183 = arith.subf %179, %182 : vector<8x1xf32>
    %184 = vector.shape_cast %183 : vector<8x1xf32> to vector<1x8x1xf32>
    %cst_72 = arith.constant dense<0.000000e+00> : vector<1xf32>
    %185 = vector.multi_reduction <add>, %184, %cst_72 [1, 2] : vector<1x8x1xf32> to vector<1xf32>
    %186 = vector.shape_cast %185 : vector<1xf32> to vector<1x1x1xf32>
    %187 = vector.extract %186[0, 0, 0] : f32 from vector<1x1x1xf32>
    %188 = vector.broadcast %187 : f32 to vector<1x1xf32>
    %cst_73 = arith.constant 1.250000e-01 : f32
    %189 = vector.broadcast %cst_73 : f32 to vector<1x1xf32>
    %190 = arith.mulf %188, %189 : vector<1x1xf32>
    %191 = math.absf %168 : vector<4x32xf32>
    %192 = vector.shape_cast %191 : vector<4x32xf32> to vector<1x4x32xf32>
    %cst_74 = arith.constant dense<0.000000e+00> : vector<1xf32>
    %193 = vector.multi_reduction <add>, %192, %cst_74 [1, 2] : vector<1x4x32xf32> to vector<1xf32>
    %194 = vector.shape_cast %193 : vector<1xf32> to vector<1x1x1xf32>
    %195 = vector.extract %194[0, 0, 0] : f32 from vector<1x1x1xf32>
    %196 = vector.broadcast %195 : f32 to vector<1x1xf32>
    %cst_75 = arith.constant 1.000000e+00 : f32
    %197 = vector.broadcast %cst_75 : f32 to vector<1x1xf32>
    %c0_76 = arith.constant 0 : index
    %198 = memref.load %arg5[%c0_76] : memref<2xf32, #tpu.memory_space<smem>>
    %199 = vector.broadcast %198 : f32 to vector<1x1xf32>
    %200 = arith.mulf %199, %197 : vector<1x1xf32>
    %201 = math.exp %200 : vector<1x1xf32>
    %c1 = arith.constant 1 : index
    %202 = memref.load %arg5[%c1] : memref<2xf32, #tpu.memory_space<smem>>
    %203 = vector.broadcast %202 : f32 to vector<1x1xf32>
    %204 = arith.mulf %203, %197 : vector<1x1xf32>
    %205 = math.exp %204 : vector<1x1xf32>
    %206 = arith.mulf %205, %196 : vector<1x1xf32>
    %207 = arith.mulf %201, %190 : vector<1x1xf32>
    %208 = arith.addf %207, %206 : vector<1x1xf32>
    %209 = tpu.iota {dimensions = array<i32: 1>} : vector<1x128xi32>
    %c0_i32 = arith.constant 0 : i32
    %210 = vector.broadcast %c0_i32 : i32 to vector<1x128xi32>
    %211 = arith.cmpi eq, %209, %210 : vector<1x128xi32>
    %cst_77 = arith.constant 0.000000e+00 : f32
    %212 = vector.shape_cast %208 : vector<1x1xf32> to vector<1x1xf32>
    %213 = vector.broadcast %212 : vector<1x1xf32> to vector<1x128xf32>
    %214 = vector.broadcast %cst_77 : f32 to vector<1x128xf32>
    %215 = arith.select %211, %213, %214 : vector<1x128xi1>, vector<1x128xf32>
    %c1_i32 = arith.constant 1 : i32
    %216 = vector.broadcast %c1_i32 : i32 to vector<1x128xi32>
    %217 = arith.cmpi eq, %209, %216 : vector<1x128xi32>
    %cst_78 = arith.constant 0.000000e+00 : f32
    %218 = vector.shape_cast %190 : vector<1x1xf32> to vector<1x1xf32>
    %219 = vector.broadcast %218 : vector<1x1xf32> to vector<1x128xf32>
    %220 = vector.broadcast %cst_78 : f32 to vector<1x128xf32>
    %221 = arith.select %217, %219, %220 : vector<1x128xi1>, vector<1x128xf32>
    %222 = arith.addf %215, %221 : vector<1x128xf32>
    %c2_i32 = arith.constant 2 : i32
    %223 = vector.broadcast %c2_i32 : i32 to vector<1x128xi32>
    %224 = arith.cmpi eq, %209, %223 : vector<1x128xi32>
    %cst_79 = arith.constant 0.000000e+00 : f32
    %225 = vector.shape_cast %206 : vector<1x1xf32> to vector<1x1xf32>
    %226 = vector.broadcast %225 : vector<1x1xf32> to vector<1x128xf32>
    %227 = vector.broadcast %cst_79 : f32 to vector<1x128xf32>
    %228 = arith.select %224, %226, %227 : vector<1x128xi1>, vector<1x128xf32>
    %229 = arith.addf %222, %228 : vector<1x128xf32>
    %c0_80 = arith.constant 0 : index
    %c0_81 = arith.constant 0 : index
    %230 = vector.load %arg6[%c0_80, %c0_81] : memref<1x128xf32, #tpu.memory_space<vmem>>, vector<1x128xf32>
    tpu.vector_store %arg6[%c0_80, %c0_81], %229 {strides = array<i32>} : memref<1x128xf32, #tpu.memory_space<vmem>>, vector<1x128xf32>,
    return
  }
}

</mosaic_0001>

<bundles_post_ra>
// kernel: tpu_custom_call.1
= control target key start
LH: loop header
LB: loop body
LE: loop exit
PB: predicated region body
PF: predicated region fallthrough
CT: control target
= control target key end

     0   :  { %11 = vsyncpa [#allocation4], 0  ;;  %s2592_s0 = inlined_call_operand.vmem [shape: f32[16,1024], index: 0, kind: input, shape index: {}]   ;;  %s2593_s1 = inlined_call_operand.vmem [shape: f32[8,4], index: 1, kind: input, shape index: {}]   ;;  %s2594_s2 = inlined_call_operand.vmem [shape: f32[8,4], index: 2, kind: input, shape index: {}]   ;;  %s2595_s3 = inlined_call_operand.vmem [shape: f32[1024,32], index: 3, kind: input, shape index: {}]   ;;  %s2596_s4 = inlined_call_operand.vmem [shape: f32[1,32], index: 4, kind: input, shape index: {}]   ;;  %s2597_s5 = inlined_call_operand.vmem [shape: f32[2], index: 5, kind: input, shape index: {}]   ;;  %s2598_s6 = inlined_call_operand.hbm [shape: f32[1,128], index: 6, kind: output, shape index: {}]  }
   0x1   :  { %12 = vsyncpa [#allocation3], 0  ;;  %s29_s23 = sshll.u32 %s2597_s5, 4  ;;  %s30_s23 = int_to_ptr.vmem [resolvable:$true] %s29_s23 }
   0x2   :  { %s1990_s24 = scalar_lea.vmem %s30_s23, 16  ;;  %p1995_p1 = scmp.lt.s32.totalorder %s30_s23, %s30_s23 }
   0x3   :  { %p1991_p0 = scmp.ne.s32.totalorder %s30_s23, %s1990_s24  ;;  %p1996_p2 = scmp.lt.s32.totalorder %s1990_s24, %s1990_s24 }
   0x5   :  { %p1997_p3 = por %p1996_p2, %p1995_p1 }
   0x7   :  { %p1998_p4 = pnand %p1997_p3, %p1991_p0 }
   0x9   :  { %2001 = shalt.err (!%p1998_p4)
}
   0xa   :  { %s2026_s25 = smov [#allocation2]  }
   0xb   :  { %32 = dma.vmem_to_smem %s30_s23, 16, %s2026_s25, [#allocation4]  }
   0xc   :  { %2022 = dma.done.wait [#allocation4], 16  }
   0xd   :  { %2023 = vsyncadd [#allocation4], 4294967280 }
   0xe   :  { %36 = sfence }
   0xf   :  { %v84_v0 = vld [vmem:[%s2595_s3 + $0xf8] sm:$0xff]  ;;  %v83_v4 = vld [vmem:[%s2595_s3 + $0xf0] sm:$0xff]  ;;  %v82_v8 = vld [vmem:[%s2595_s3 + $0xe8] sm:$0xff]  ;;  %vm2028_vm0 = vmmov 0   ;;  %vm491_vm1 = vcmask 261120   ;;  %vm570_vm2 = vcmask 31744  }
  0x10   :  { %v116_v1 = vld [vmem:[%s2595_s3 + $0x1f8] sm:$0xff]  ;;  %1705 = vmatprep.subr.mxu0 %v84_v0  ;;  %v115_v5 = vld [vmem:[%s2595_s3 + $0x1f0] sm:$0xff]  ;;  %v114_v9 = vld [vmem:[%s2595_s3 + $0x1e8] sm:$0xff]  ;;  %vm610_vm3 = vcmask 64512   ;;  %vm1624_vm14 = vcmask 7168   ;;  %vm1638_vm15 = vcmask 257024  }
  0x11   :  { %v68_v2 = vld [vmem:[%s2595_s3 + $0x78] sm:$0xff]  ;;  %1743 = vmatprep.subr.mxu1 %v116_v1  ;;  %v67_v6 = vld [vmem:[%s2595_s3 + $0x70] sm:$0xff]  ;;  %v66_v10 = vld [vmem:[%s2595_s3 + $0x68] sm:$0xff]  ;;  %s1704_s16 = sld [smem:[#allocation2 + $0x1]]  ;;  %s2029_s19 = smov [#allocation5]  }
  0x12   :  { %v100_v3 = vld [vmem:[%s2595_s3 + $0x178] sm:$0xff]  ;;  %1706 = vmatpush3.msra.mxu0 %v68_v2  ;;  %v99_v7 = vld [vmem:[%s2595_s3 + $0x170] sm:$0xff]  ;;  %v98_v11 = vld [vmem:[%s2595_s3 + $0x168] sm:$0xff]  ;;  %s1678_s20 = sshll.u32 %s2029_s19, 4  ;;  %s1679_s20 = int_to_ptr.vmem [resolvable:$true] %s1678_s20 }
  0x13   :  { %1744 = vmatpush3.msra.mxu1 %v100_v3  ;;  %1707 = vmatprep.subr.mxu0 %v83_v4  ;;  %v81_v12 = vld [vmem:[%s2595_s3 + $0xe0] sm:$0xff]  ;;  %v80_v16 = vld [vmem:[%s2595_s3 + $0xd8] sm:$0xff]  ;;  %v79_v20 = vld [vmem:[%s2595_s3 + $0xd0] sm:$0xff]  ;;  %s2002_s21 = scalar_lea.vmem %s1679_s20, 16  ;;  %s2006_s22 = scalar_lea.vmem %s1679_s20, 32 }
  0x14   :  { %1745 = vmatprep.subr.mxu1 %v115_v5  ;;  %1708 = vmatpush3.msra.mxu0 %v67_v6  ;;  %v113_v13 = vld [vmem:[%s2595_s3 + $0x1e0] sm:$0xff]  ;;  %v112_v17 = vld [vmem:[%s2595_s3 + $0x1d8] sm:$0xff]  ;;  %v111_v21 = vld [vmem:[%s2595_s3 + $0x1d0] sm:$0xff]  ;;  %p2003_p5 = scmp.ne.s32.totalorder %s1679_s20, %s2002_s21  ;;  %p2007_p6 = scmp.lt.s32.totalorder %s1679_s20, %s1679_s20 }
  0x15   :  { %1746 = vmatpush3.msra.mxu1 %v99_v7  ;;  %1709 = vmatprep.subr.mxu0 %v82_v8  ;;  %v65_v14 = vld [vmem:[%s2595_s3 + $0x60] sm:$0xff]  ;;  %v64_v18 = vld [vmem:[%s2595_s3 + $0x58] sm:$0xff]  ;;  %v63_v22 = vld [vmem:[%s2595_s3 + $0x50] sm:$0xff]  ;;  %p2008_p7 = scmp.lt.s32.totalorder %s2006_s22, %s2002_s21 }
  0x16   :  { %1747 = vmatprep.subr.mxu1 %v114_v9  ;;  %v97_v15 = vld [vmem:[%s2595_s3 + $0x160] sm:$0xff]  ;;  %1710 = vmatpush3.msra.mxu0 %v66_v10  ;;  %v96_v19 = vld [vmem:[%s2595_s3 + $0x158] sm:$0xff]  ;;  %v95_v23 = vld [vmem:[%s2595_s3 + $0x150] sm:$0xff] }
  0x17   :  { %1748 = vmatpush3.msra.mxu1 %v98_v11  ;;  %1711 = vmatprep.subr.mxu0 %v81_v12  ;;  %v78_v24 = vld [vmem:[%s2595_s3 + $0xc8] sm:$0xff]  ;;  %v77_v28 = vld [vmem:[%s2595_s3 + $0xc0] sm:$0xff]  ;;  %v76_v32 = vld [vmem:[%s2595_s3 + $0xb8] sm:$0xff]  ;;  %p2009_p8 = por %p2008_p7, %p2007_p6 }
  0x18   :  { %1749 = vmatprep.subr.mxu1 %v113_v13  ;;  %1712 = vmatpush3.msra.mxu0 %v65_v14  ;;  %v110_v25 = vld [vmem:[%s2595_s3 + $0x1c8] sm:$0xff]  ;;  %v109_v29 = vld [vmem:[%s2595_s3 + $0x1c0] sm:$0xff]  ;;  %v108_v33 = vld [vmem:[%s2595_s3 + $0x1b8] sm:$0xff] }
  0x19   :  { %1750 = vmatpush3.msra.mxu1 %v97_v15  ;;  %1713 = vmatprep.subr.mxu0 %v80_v16  ;;  %v62_v26 = vld [vmem:[%s2595_s3 + $0x48] sm:$0xff]  ;;  %v61_v30 = vld [vmem:[%s2595_s3 + $0x40] sm:$0xff]  ;;  %v60_v34 = vld [vmem:[%s2595_s3 + $0x38] sm:$0xff]  ;;  %p2010_p9 = pnand %p2009_p8, %p2003_p5 }
  0x1a   :  { %1751 = vmatprep.subr.mxu1 %v112_v17  ;;  %1714 = vmatpush3.msra.mxu0 %v64_v18  ;;  %v94_v27 = vld [vmem:[%s2595_s3 + $0x148] sm:$0xff]  ;;  %v93_v31 = vld [vmem:[%s2595_s3 + $0x140] sm:$0xff]  ;;  %v92_v35 = vld [vmem:[%s2595_s3 + $0x138] sm:$0xff] }
  0x1b   :  { %1752 = vmatpush3.msra.mxu1 %v96_v19  ;;  %1715 = vmatprep.subr.mxu0 %v79_v20  ;;  %v75_v36 = vld [vmem:[%s2595_s3 + $0xb0] sm:$0xff]  ;;  %v74_v40 = vld [vmem:[%s2595_s3 + $0xa8] sm:$0xff]  ;;  %v73_v44 = vld [vmem:[%s2595_s3 + $0xa0] sm:$0xff] }
  0x1c   :  { %1753 = vmatprep.subr.mxu1 %v111_v21  ;;  %1716 = vmatpush3.msra.mxu0 %v63_v22  ;;  %v107_v37 = vld [vmem:[%s2595_s3 + $0x1b0] sm:$0xff]  ;;  %v106_v41 = vld [vmem:[%s2595_s3 + $0x1a8] sm:$0xff]  ;;  %v105_v45 = vld [vmem:[%s2595_s3 + $0x1a0] sm:$0xff] }
  0x1d   :  { %1754 = vmatpush3.msra.mxu1 %v95_v23  ;;  %1717 = vmatprep.subr.mxu0 %v78_v24  ;;  %v59_v38 = vld [vmem:[%s2595_s3 + $0x30] sm:$0xff]  ;;  %v58_v42 = vld [vmem:[%s2595_s3 + $0x28] sm:$0xff]  ;;  %v57_v46 = vld [vmem:[%s2595_s3 + $0x20] sm:$0xff] }
  0x1e   :  { %1755 = vmatprep.subr.mxu1 %v110_v25  ;;  %1718 = vmatpush3.msra.mxu0 %v62_v26  ;;  %v91_v39 = vld [vmem:[%s2595_s3 + $0x130] sm:$0xff]  ;;  %v90_v43 = vld [vmem:[%s2595_s3 + $0x128] sm:$0xff]  ;;  %v89_v47 = vld [vmem:[%s2595_s3 + $0x120] sm:$0xff] }
  0x1f   :  { %1756 = vmatpush3.msra.mxu1 %v94_v27  ;;  %1719 = vmatprep.subr.mxu0 %v77_v28  ;;  %v72_v48 = vld [vmem:[%s2595_s3 + $0x98] sm:$0xff]  ;;  %v71_v52 = vld [vmem:[%s2595_s3 + $0x90] sm:$0xff]  ;;  %v70_v56 = vld [vmem:[%s2595_s3 + $0x88] sm:$0xff] }
  0x20   :  { %1757 = vmatprep.subr.mxu1 %v109_v29  ;;  %1720 = vmatpush3.msra.mxu0 %v61_v30  ;;  %v104_v49 = vld [vmem:[%s2595_s3 + $0x198] sm:$0xff]  ;;  %v103_v53 = vld [vmem:[%s2595_s3 + $0x190] sm:$0xff]  ;;  %v102_v57 = vld [vmem:[%s2595_s3 + $0x188] sm:$0xff] }
  0x21   :  { %1758 = vmatpush3.msra.mxu1 %v93_v31  ;;  %1721 = vmatprep.subr.mxu0 %v76_v32  ;;  %v56_v50 = vld [vmem:[%s2595_s3 + $0x18] sm:$0xff]  ;;  %v55_v54 = vld [vmem:[%s2595_s3 + $0x10] sm:$0xff]  ;;  %v54_v58 = vld [vmem:[%s2595_s3 + $0x8] sm:$0xff] }
  0x22   :  { %1759 = vmatprep.subr.mxu1 %v108_v33  ;;  %1722 = vmatpush3.msra.mxu0 %v60_v34  ;;  %v88_v51 = vld [vmem:[%s2595_s3 + $0x118] sm:$0xff]  ;;  %v87_v55 = vld [vmem:[%s2595_s3 + $0x110] sm:$0xff]  ;;  %v86_v59 = vld [vmem:[%s2595_s3 + $0x108] sm:$0xff] }
  0x23   :  { %1760 = vmatpush3.msra.mxu1 %v92_v35  ;;  %1723 = vmatprep.subr.mxu0 %v75_v36  ;;  %v69_v60 = vld [vmem:[%s2595_s3 + $0x80] sm:$0xff]  ;;  %v38_v63 = vld [vmem:[%s2592_s0 + $0x8] sm:$0xff]  ;;  %v40_v2 = vld [vmem:[%s2592_s0 + $0x18] sm:$0xff] }
  0x24   :  { %1761 = vmatprep.subr.mxu1 %v107_v37  ;;  %1724 = vmatpush3.msra.mxu0 %v59_v38  ;;  %v101_v61 = vld [vmem:[%s2595_s3 + $0x180] sm:$0xff]  ;;  %v148_v3 = vld [vmem:[%s2595_s3 + $0x2f8] sm:$0xff]  ;;  %v39_v5 = vld [vmem:[%s2592_s0 + $0x10] sm:$0xff] }
  0x25   :  { %1762 = vmatpush3.msra.mxu1 %v91_v39  ;;  %1725 = vmatprep.subr.mxu0 %v74_v40  ;;  %v53_v62 = vld [vmem:[%s2595_s3] sm:$0xff]  ;;  %v180_v4 = vld [vmem:[%s2595_s3 + $0x3f8] sm:$0xff]  ;;  %v147_v8 = vld [vmem:[%s2595_s3 + $0x2f0] sm:$0xff] }
  0x26   :  { %1763 = vmatprep.subr.mxu1 %v106_v41  ;;  %1726 = vmatpush3.msra.mxu0 %v58_v42  ;;  %v85_v0 = vld [vmem:[%s2595_s3 + $0x100] sm:$0xff]  ;;  %v132_v6 = vld [vmem:[%s2595_s3 + $0x278] sm:$0xff]  ;;  %v179_v9 = vld [vmem:[%s2595_s3 + $0x3f0] sm:$0xff] }
  0x27   :  { %1764 = vmatpush3.msra.mxu1 %v90_v43  ;;  %1727 = vmatprep.subr.mxu0 %v73_v44  ;;  %v37_v1 = vld [vmem:[%s2592_s0] sm:$0xff]  ;;  %v164_v7 = vld [vmem:[%s2595_s3 + $0x378] sm:$0xff]  ;;  %v131_v10 = vld [vmem:[%s2595_s3 + $0x270] sm:$0xff] }
  0x28   :  { %1765 = vmatprep.subr.mxu1 %v105_v45  ;;  %1728 = vmatpush3.msra.mxu0 %v57_v46  ;;  %v163_v11 = vld [vmem:[%s2595_s3 + $0x370] sm:$0xff]  ;;  %v146_v12 = vld [vmem:[%s2595_s3 + $0x2e8] sm:$0xff]  ;;  %v145_v16 = vld [vmem:[%s2595_s3 + $0x2e0] sm:$0xff] }
  0x29   :  { %1766 = vmatpush3.msra.mxu1 %v89_v47  ;;  %1729 = vmatprep.subr.mxu0 %v72_v48  ;;  %v178_v13 = vld [vmem:[%s2595_s3 + $0x3e8] sm:$0xff]  ;;  %v177_v17 = vld [vmem:[%s2595_s3 + $0x3e0] sm:$0xff]  ;;  %v144_v20 = vld [vmem:[%s2595_s3 + $0x2d8] sm:$0xff] }
  0x2a   :  { %1767 = vmatprep.subr.mxu1 %v104_v49  ;;  %1730 = vmatpush3.msra.mxu0 %v56_v50  ;;  %v130_v14 = vld [vmem:[%s2595_s3 + $0x268] sm:$0xff]  ;;  %v129_v18 = vld [vmem:[%s2595_s3 + $0x260] sm:$0xff]  ;;  %v176_v21 = vld [vmem:[%s2595_s3 + $0x3d8] sm:$0xff] }
  0x2b   :  { %1768 = vmatpush3.msra.mxu1 %v88_v51  ;;  %1731 = vmatprep.subr.mxu0 %v71_v52  ;;  %v162_v15 = vld [vmem:[%s2595_s3 + $0x368] sm:$0xff]  ;;  %v161_v19 = vld [vmem:[%s2595_s3 + $0x360] sm:$0xff]  ;;  %v128_v22 = vld [vmem:[%s2595_s3 + $0x258] sm:$0xff] }
  0x2c   :  { %1769 = vmatprep.subr.mxu1 %v103_v53  ;;  %1732 = vmatpush3.msra.mxu0 %v55_v54  ;;  %v160_v23 = vld [vmem:[%s2595_s3 + $0x358] sm:$0xff]  ;;  %v143_v24 = vld [vmem:[%s2595_s3 + $0x2d0] sm:$0xff]  ;;  %v142_v28 = vld [vmem:[%s2595_s3 + $0x2c8] sm:$0xff] }
  0x2d   :  { %1770 = vmatpush3.msra.mxu1 %v87_v55  ;;  %1733 = vmatprep.subr.mxu0 %v70_v56  ;;  %v175_v25 = vld [vmem:[%s2595_s3 + $0x3d0] sm:$0xff]  ;;  %v174_v29 = vld [vmem:[%s2595_s3 + $0x3c8] sm:$0xff]  ;;  %v141_v32 = vld [vmem:[%s2595_s3 + $0x2c0] sm:$0xff] }
  0x2e   :  { %1771 = vmatprep.subr.mxu1 %v102_v57  ;;  %1734 = vmatpush3.msra.mxu0 %v54_v58  ;;  %v127_v26 = vld [vmem:[%s2595_s3 + $0x250] sm:$0xff]  ;;  %v126_v30 = vld [vmem:[%s2595_s3 + $0x248] sm:$0xff]  ;;  %v173_v33 = vld [vmem:[%s2595_s3 + $0x3c0] sm:$0xff] }
  0x2f   :  { %1772 = vmatpush3.msra.mxu1 %v86_v59  ;;  %1735 = vmatprep.subr.mxu0 %v69_v60  ;;  %v159_v27 = vld [vmem:[%s2595_s3 + $0x350] sm:$0xff]  ;;  %v158_v31 = vld [vmem:[%s2595_s3 + $0x348] sm:$0xff]  ;;  %v125_v34 = vld [vmem:[%s2595_s3 + $0x240] sm:$0xff] }
  0x30   :  { %1773 = vmatprep.subr.mxu1 %v101_v61  ;;  %1736 = vmatpush3.msra.mxu0 %v53_v62  ;;  %v157_v35 = vld [vmem:[%s2595_s3 + $0x340] sm:$0xff]  ;;  %v140_v36 = vld [vmem:[%s2595_s3 + $0x2b8] sm:$0xff]  ;;  %v139_v40 = vld [vmem:[%s2595_s3 + $0x2b0] sm:$0xff] }
  0x31   :  { %252 = vmatprep.mubr.f32.mxu0 %v38_v63  ;;  %1774 = vmatpush3.msra.mxu1 %v85_v0  ;;  %v172_v37 = vld [vmem:[%s2595_s3 + $0x3b8] sm:$0xff]  ;;  %v171_v41 = vld [vmem:[%s2595_s3 + $0x3b0] sm:$0xff]  ;;  %v138_v44 = vld [vmem:[%s2595_s3 + $0x2a8] sm:$0xff] }
  0x32   :  { %253 = vmatmul.mubr.f32.vlgmr.msra.gmra.mxu0 %v37_v1  ;;  %327 = vmatprep.mubr.f32.mxu1 %v40_v2  ;;  %v124_v38 = vld [vmem:[%s2595_s3 + $0x238] sm:$0xff]  ;;  %v123_v42 = vld [vmem:[%s2595_s3 + $0x230] sm:$0xff]  ;;  %v170_v45 = vld [vmem:[%s2595_s3 + $0x3a8] sm:$0xff] }
  0x33   :  { %1781 = vmatprep.subr.mxu0 %v148_v3  ;;  %1819 = vmatprep.subr.mxu1 %v180_v4  ;;  %v156_v39 = vld [vmem:[%s2595_s3 + $0x338] sm:$0xff]  ;;  %v155_v43 = vld [vmem:[%s2595_s3 + $0x330] sm:$0xff]  ;;  %v122_v46 = vld [vmem:[%s2595_s3 + $0x228] sm:$0xff] }
  0x34   :  { %328 = vmatmul.mubr.f32.vlgmr.msra.gmra.mxu1 %v39_v5  ;;  %1782 = vmatpush3.msra.mxu0 %v132_v6  ;;  %v154_v47 = vld [vmem:[%s2595_s3 + $0x328] sm:$0xff]  ;;  %v137_v48 = vld [vmem:[%s2595_s3 + $0x2a0] sm:$0xff]  ;;  %v136_v52 = vld [vmem:[%s2595_s3 + $0x298] sm:$0xff] }
  0x35   :  { %1820 = vmatpush3.msra.mxu1 %v164_v7  ;;  %1783 = vmatprep.subr.mxu0 %v147_v8  ;;  %v169_v49 = vld [vmem:[%s2595_s3 + $0x3a0] sm:$0xff]  ;;  %v168_v53 = vld [vmem:[%s2595_s3 + $0x398] sm:$0xff]  ;;  %v46_v54 = vld [vmem:[%s2592_s0 + $0x48] sm:$0xff] }
  0x36   :  { %1821 = vmatprep.subr.mxu1 %v179_v9  ;;  %1784 = vmatpush3.msra.mxu0 %v131_v10  ;;  %v121_v50 = vld [vmem:[%s2595_s3 + $0x220] sm:$0xff]  ;;  %v120_v55 = vld [vmem:[%s2595_s3 + $0x218] sm:$0xff]  ;;  %v135_v58 = vld [vmem:[%s2595_s3 + $0x290] sm:$0xff] }
  0x37   :  { %1822 = vmatpush3.msra.mxu1 %v163_v11  ;;  %1785 = vmatprep.subr.mxu0 %v146_v12  ;;  %v153_v51 = vld [vmem:[%s2595_s3 + $0x320] sm:$0xff]  ;;  %v152_v56 = vld [vmem:[%s2595_s3 + $0x318] sm:$0xff]  ;;  %v167_v59 = vld [vmem:[%s2595_s3 + $0x390] sm:$0xff] }
  0x38   :  { %1823 = vmatprep.subr.mxu1 %v178_v13  ;;  %1786 = vmatpush3.msra.mxu0 %v130_v14  ;;  %v45_v57 = vld [vmem:[%s2592_s0 + $0x40] sm:$0xff]  ;;  %v48_v60 = vld [vmem:[%s2592_s0 + $0x58] sm:$0xff]  ;;  %v119_v61 = vld [vmem:[%s2595_s3 + $0x210] sm:$0xff] }
  0x39   :  { %1824 = vmatpush3.msra.mxu1 %v162_v15  ;;  %1787 = vmatprep.subr.mxu0 %v145_v16  ;;  %v151_v62 = vld [vmem:[%s2595_s3 + $0x310] sm:$0xff]  ;;  %v134_v63 = vld [vmem:[%s2595_s3 + $0x288] sm:$0xff]  ;;  %v133_v4 = vld [vmem:[%s2595_s3 + $0x280] sm:$0xff]  ;;  %v2027_v16 = vmov 0.0  }
  0x3a   :  { %1825 = vmatprep.subr.mxu1 %v177_v17  ;;  %1788 = vmatpush3.msra.mxu0 %v129_v18  ;;  %v47_v0 = vld [vmem:[%s2592_s0 + $0x50] sm:$0xff]  ;;  %v166_v1 = vld [vmem:[%s2595_s3 + $0x388] sm:$0xff]  ;;  %v165_v5 = vld [vmem:[%s2595_s3 + $0x380] sm:$0xff] }
  0x3b   :  { %1826 = vmatpush3.msra.mxu1 %v161_v19  ;;  %1789 = vmatprep.subr.mxu0 %v144_v20  ;;  %v118_v2 = vld [vmem:[%s2595_s3 + $0x208] sm:$0xff]  ;;  %v117_v6 = vld [vmem:[%s2595_s3 + $0x200] sm:$0xff]  ;;  %v44_v9 = vld [vmem:[%s2592_s0 + $0x38] sm:$0xff] }
  0x3c   :  { %1827 = vmatprep.subr.mxu1 %v176_v21  ;;  %1790 = vmatpush3.msra.mxu0 %v128_v22  ;;  %v150_v3 = vld [vmem:[%s2595_s3 + $0x308] sm:$0xff]  ;;  %v149_v8 = vld [vmem:[%s2595_s3 + $0x300] sm:$0xff]  ;;  %v43_v11 = vld [vmem:[%s2592_s0 + $0x30] sm:$0xff] }
  0x3d   :  { %1828 = vmatpush3.msra.mxu1 %v160_v23  ;;  %1791 = vmatprep.subr.mxu0 %v143_v24  ;;  %v42_v7 = vld [vmem:[%s2592_s0 + $0x28] sm:$0xff]  ;;  %v41_v10 = vld [vmem:[%s2592_s0 + $0x20] sm:$0xff]  ;;  %v52_v13 = vld [vmem:[%s2592_s0 + $0x78] sm:$0xff] }
  0x3e   :  { %1829 = vmatprep.subr.mxu1 %v175_v25  ;;  %1792 = vmatpush3.msra.mxu0 %v127_v26  ;;  %v50_v12 = vld [vmem:[%s2592_s0 + $0x68] sm:$0xff]  ;;  %v49_v14 = vld [vmem:[%s2592_s0 + $0x60] sm:$0xff]  ;;  %v51_v15 = vld [vmem:[%s2592_s0 + $0x70] sm:$0xff] }
  0x3f   :  { %1830 = vmatpush3.msra.mxu1 %v159_v27  ;;  %1793 = vmatprep.subr.mxu0 %v142_v28  ;;  %v1687_v24 = vld [vmem:[%s2596_s4] ss:$0 sm:$0xff] }
  0x40   :  { %1831 = vmatprep.subr.mxu1 %v174_v29  ;;  %1794 = vmatpush3.msra.mxu0 %v126_v30 }
  0x41   :  { %1832 = vmatpush3.msra.mxu1 %v158_v31  ;;  %1795 = vmatprep.subr.mxu0 %v141_v32 }
  0x42   :  { %1833 = vmatprep.subr.mxu1 %v173_v33  ;;  %1796 = vmatpush3.msra.mxu0 %v125_v34 }
  0x43   :  { %1834 = vmatpush3.msra.mxu1 %v157_v35  ;;  %1797 = vmatprep.subr.mxu0 %v140_v36 }
  0x44   :  { %1835 = vmatprep.subr.mxu1 %v172_v37  ;;  %1798 = vmatpush3.msra.mxu0 %v124_v38 }
  0x45   :  { %1836 = vmatpush3.msra.mxu1 %v156_v39  ;;  %1799 = vmatprep.subr.mxu0 %v139_v40 }
  0x46   :  { %1837 = vmatprep.subr.mxu1 %v171_v41  ;;  %1800 = vmatpush3.msra.mxu0 %v123_v42 }
  0x47   :  { %1838 = vmatpush3.msra.mxu1 %v155_v43  ;;  %1801 = vmatprep.subr.mxu0 %v138_v44 }
  0x48   :  { %1839 = vmatprep.subr.mxu1 %v170_v45  ;;  %1802 = vmatpush3.msra.mxu0 %v122_v46 }
  0x49   :  { %1840 = vmatpush3.msra.mxu1 %v154_v47  ;;  %1803 = vmatprep.subr.mxu0 %v137_v48 }
  0x4a   :  { %1841 = vmatprep.subr.mxu1 %v169_v49  ;;  %1804 = vmatpush3.msra.mxu0 %v121_v50 }
  0x4b   :  { %1842 = vmatpush3.msra.mxu1 %v153_v51  ;;  %1805 = vmatprep.subr.mxu0 %v136_v52 }
  0x4c   :  { %1843 = vmatprep.subr.mxu1 %v168_v53  ;;  %257 = vmatprep.mubr.f32.mxu0 %v46_v54 }
  0x4d   :  { %1806 = vmatpush3.msra.mxu0 %v120_v55  ;;  %1844 = vmatpush3.msra.mxu1 %v152_v56 }
  0x4e   :  { %258 = vmatmul.mubr.f32.gmra.mxu0 %v45_v57  ;;  %1807 = vmatprep.subr.mxu0 %v135_v58  ;;  %v2525_v58 = vld [vmem:[%s2593_s1] sm:$0xff] }
  0x4f   :  { %1845 = vmatprep.subr.mxu1 %v167_v59  ;;  %332 = vmatprep.mubr.f32.mxu1 %v48_v60 }
  0x50   :  { %1808 = vmatpush3.msra.mxu0 %v119_v61  ;;  %1846 = vmatpush3.msra.mxu1 %v151_v62 }
  0x51   :  { %1809 = vmatprep.subr.mxu0 %v134_v63  ;;  %333 = vmatmul.mubr.f32.gmra.mxu1 %v47_v0 }
  0x52   :  { %1847 = vmatprep.subr.mxu1 %v166_v1  ;;  %1810 = vmatpush3.msra.mxu0 %v118_v2 }
  0x53   :  { %1848 = vmatpush3.msra.mxu1 %v150_v3  ;;  %1811 = vmatprep.subr.mxu0 %v133_v4 }
  0x54   :  { %1849 = vmatprep.subr.mxu1 %v165_v5  ;;  %1812 = vmatpush3.msra.mxu0 %v117_v6 }
  0x55   :  { %402 = vmatprep.mubr.f32.mxu0 %v42_v7  ;;  %1850 = vmatpush3.msra.mxu1 %v149_v8 }
  0x56   :  { %477 = vmatprep.mubr.f32.mxu1 %v44_v9  ;;  %403 = vmatmul.mubr.f32.vlgmr.msra.gmra.mxu0 %v41_v10 }
  0x57   :  { %478 = vmatmul.mubr.f32.vlgmr.msra.gmra.mxu1 %v43_v11  ;;  %407 = vmatprep.mubr.f32.mxu0 %v50_v12 }
  0x58   :  { %482 = vmatprep.mubr.f32.mxu1 %v52_v13  ;;  %1879 = vmatprep.subr.mxu0 %v2027_v16 }
  0x59   :  { %1884 = vmatprep.subr.mxu1 %v2027_v16  ;;  %1880 = vmatpush3.xpose.msra.mxu0 %v2027_v16 }
  0x5a   :  { %408 = vmatmul.mubr.f32.gmra.mxu0 %v49_v14  ;;  %1889 = vmatprep.subr.mxu0 %v2027_v16 }
  0x5b   :  { %483 = vmatmul.mubr.f32.gmra.mxu1 %v51_v15  ;;  %1881 = vmatprep.mubr.msk.f32.mxu0 %vm2028_vm0, %v2027_v16 }
  0x5c   :  { %1886 = vmatprep.mubr.msk.f32.mxu1 %vm2028_vm0, %v2027_v16 }
  0xf2   :  { %v1737_v17 = vpop.f32.mrf.mxu0 }
  0xf4   :  { %v1775_v18 = vpop.f32.mrf.mxu1  ;;  %v1738_v19 = vpop.f32.mrf.mxu0 }
  0xf5   :  { %v1739_v25 = vadd.f32 %v1738_v19, %v1737_v17 }
  0xf6   :  { %v1776_v21 = vpop.f32.mrf.mxu1 }
  0xf7   :  { %v255_v30 = vadd.f32 %v1739_v25, %v1687_v24  ;;  %v1777_v31 = vadd.f32 %v1776_v21, %v1775_v18 }
  0xf9   :  { %v330_v37 = vadd.f32 %v1777_v31, %v255_v30 }
 0x10e   :  { %v1740_v20 = vpop.f32.mrf.mxu0 }
 0x110   :  { %v1741_v22 = vpop.f32.mrf.mxu0 }
 0x111   :  { %v1742_v23 = vadd.f32 %v1741_v22, %v1740_v20  ;;  %v1778_v26 = vpop.f32.mrf.mxu1 }
 0x113   :  { %v260_v27 = vadd.f32 %v1742_v23, %v1687_v24  ;;  %v1779_v28 = vpop.f32.mrf.mxu1 }
 0x114   :  { %v1780_v29 = vadd.f32 %v1779_v28, %v1778_v26 }
 0x116   :  { %v335_v32 = vadd.f32 %v1780_v29, %v260_v27  ;;  %v1813_v33 = vpop.f32.mrf.mxu0 }
 0x117   :  { %v1851_v34 = vpop.f32.mrf.mxu1 }
 0x118   :  { %v1814_v35 = vpop.f32.mrf.mxu0 }
 0x119   :  { %v1852_v36 = vpop.f32.mrf.mxu1  ;;  %v1815_v38 = vadd.f32 %v1814_v35, %v1813_v33 }
 0x11a   :  { %v1816_v39 = vpop.f32.mrf.mxu0  ;;  %v1853_v42 = vadd.f32 %v1852_v36, %v1851_v34 }
 0x11b   :  { %v1854_v40 = vpop.f32.mrf.mxu1  ;;  %v405_v41 = vadd.f32 %v1815_v38, %v330_v37 }
 0x11c   :  { %v1817_v43 = vpop.f32.mrf.mxu0 }
 0x11d   :  { %v1855_v44 = vpop.f32.mrf.mxu1  ;;  %v480_v45 = vadd.f32 %v1853_v42, %v405_v41  ;;  %v1818_v46 = vadd.f32 %v1817_v43, %v1816_v39 }
 0x11e   :  { %v1856_v47 = vadd.f32 %v1855_v44, %v1854_v40 }
 0x11f   :  { %v2511_v48 = vmax.f32 %v480_v45, 0.0  ;;  %v410_v49 = vadd.f32 %v1818_v46, %v335_v32 }
 0x121   :  { %v2513_v50 = vadd.f32 %v1856_v47, %v410_v49  ;;  %1882 = vmatmul.mubr.msk.f32.vlgmr.msra.gmra.mxu0 %vm491_vm1, %v2511_v48  ;;  %1885 = vmatpush3.msra.mxu1 %v2511_v48 }
 0x122   :  { %1894 = vmatprep.subr.mxu1 %v2027_v16  ;;  %1891 = vmatprep.mubr.msk.f32.mxu0 %vm2028_vm0, %v2027_v16 }
 0x1e1   :  { %v564_v51 = vpop.f32.mrf.mxu0 }
 0x1e2   :  { %v568_v52 = vmul.f32 1.442695, %v564_v51 }
 0x1e3   :  { %v1883_v53 = vpop.f32.mrf.mxu0 }
 0x1e4   :  { %1942 = vpow2.f32 %v568_v52 }
 0x1f1   :  { %v1943_v54 = vpop.eup %1942 }
 0x1f2   :  { %v571_v55 = vsel %vm570_vm2, %v1943_v54, 0.0 }
 0x1f3   :  { %572 = vadd.xlane.f32.xlu0 %v571_v55 }
 0x27c   :  { %v573_v56 = vpop.xlane.xlu0 %572 }
 0x27d   :  { %1944 = vrcp.f32 %v573_v56 }
 0x28a   :  { %v1945_v57 = vpop.eup %1944 }
 0x28b   :  { %v575_v59 = vmul.f32 %v1945_v57, %v1943_v54 }
 0x28d   :  { %v576_v60 = vsub.f32 %v575_v59, %v2525_v58 }
 0x28f   :  { %v577_v61 = vmul.f32 0.125, %v576_v60 }
 0x291   :  { %578 = vxpose.xlu0.b32.start.end [1/1] (short) (narrow) %v577_v61, 8 }
 0x30d   :  { %v594_v62 = vpop.trf.xlu0 }
 0x30e   :  { %1887 = vmatmul.mubr.msk.f32.vlgmr.msra.gmra.mxu1 %vm610_vm3, %v594_v62 }
 0x30f   :  { %1895 = vmatpush3.msra.mxu1 %v2511_v48  ;;  %1896 = vmatprep.mubr.msk.f32.mxu1 %vm2028_vm0, %v2027_v16 }
 0x310   :  { %1904 = vmatprep.subr.mxu1 %v2027_v16 }
 0x3ce   :  { %v680_v63 = vpop.f32.mrf.mxu1 }
 0x3cf   :  { %v686_v0 = vmul.f32 0.001, %v680_v63  ;;  %v684_v10 = vmul.f32 0.1, %v680_v63 }
 0x3d0   :  { %v1888_v1 = vpop.f32.mrf.mxu1 }
 0x3d1   :  { %v687_v2 = vmul.f32 %v686_v0, %v680_v63  ;;  %v698_v11 = vmul.f32 0.1, %v684_v10  ;;  %v889_v41 = vmul.f32 0.9, %v684_v10 }
 0x3d3   :  { %1946 = vrsqrt.f32 %v687_v2  ;;  %vm691_vm4 = vcmp.eq.f32.partialorder %v687_v2, inf  ;;  %v694_v5 = vand.u32 2147483648, %v687_v2  ;;  %vm693_vm5 = vcmp.eq.f32.partialorder %v687_v2, 0.0 }
 0x3d4   :  { %v892_v30 = vmul.f32 0.999, %v687_v2 }
 0x3e0   :  { %v1947_v3 = vpop.eup %1946 }
 0x3e1   :  { %v690_v4 = vmul.f32 %v1947_v3, %v687_v2 }
 0x3e3   :  { %v692_v6 = vsel %vm691_vm4, %v687_v2, %v690_v4 }
 0x3e4   :  { %v695_v7 = vsel %vm693_vm5, %v694_v5, %v692_v6 }
 0x3e5   :  { %v696_v8 = vmul.f32 31.622776, %v695_v7 }
 0x3e7   :  { %v697_v9 = vadd.f32 1e-08, %v696_v8 }
 0x3e9   :  { %1948 = vrcp.f32 %v697_v9 }
 0x3f6   :  { %v1949_v12 = vpop.eup %1948 }
 0x3f7   :  { %v700_v13 = vmul.f32 %v1949_v12, %v698_v11 }
 0x3f9   :  { %v701_v14 = vsub.f32 0.0, %v700_v13 }
 0x3fb   :  { %1890 = vmatpush3.xpose.msk.msra.mxu0 %vm491_vm1, %v701_v14 }
 0x3fc   :  { %1899 = vmatprep.subr.mxu0 %v2027_v16 }
 0x3fe   :  { %1892 = vmatmul.mubr.msk.f32.vlgmr.msra.gmra.mxu0 %vm491_vm1, %v2511_v48 }
 0x3ff   :  { %1901 = vmatprep.mubr.msk.f32.mxu0 %vm2028_vm0, %v2027_v16 }
 0x4be   :  { %v771_v15 = vpop.f32.mrf.mxu0 }
 0x4bf   :  { %v775_v17 = vmul.f32 1.442695, %v771_v15 }
 0x4c0   :  { %v1893_v18 = vpop.f32.mrf.mxu0 }
 0x4c1   :  { %1950 = vpow2.f32 %v775_v17 }
 0x4ce   :  { %v1951_v19 = vpop.eup %1950 }
 0x4cf   :  { %v777_v20 = vsel %vm570_vm2, %v1951_v19, 0.0 }
 0x4d0   :  { %778 = vadd.xlane.f32.xlu1 %v777_v20 }
 0x559   :  { %v779_v21 = vpop.xlane.xlu1 %778 }
 0x55a   :  { %1952 = vrcp.f32 %v779_v21 }
 0x567   :  { %v1953_v22 = vpop.eup %1952 }
 0x568   :  { %v781_v23 = vmul.f32 %v1953_v22, %v1951_v19 }
 0x56a   :  { %v782_v24 = vsub.f32 %v781_v23, %v2525_v58 }
 0x56c   :  { %v783_v25 = vmul.f32 0.125, %v782_v24 }
 0x56e   :  { %784 = vxpose.xlu1.b32.start.end [1/1] (short) (narrow) %v783_v25, 8 }
 0x5ea   :  { %v800_v26 = vpop.trf.xlu1 }
 0x5eb   :  { %1897 = vmatmul.mubr.msk.f32.vlgmr.msra.gmra.mxu1 %vm610_vm3, %v800_v26 }
 0x5ec   :  { %1905 = vmatpush3.msra.mxu1 %v2511_v48  ;;  %1906 = vmatprep.mubr.msk.f32.mxu1 %vm2028_vm0, %v2027_v16 }
 0x5ed   :  { %1914 = vmatprep.subr.mxu1 %v2027_v16 }
 0x6ab   :  { %v885_v27 = vpop.f32.mrf.mxu1 }
 0x6ac   :  { %v893_v28 = vmul.f32 0.001, %v885_v27  ;;  %v890_v40 = vmul.f32 0.1, %v885_v27 }
 0x6ad   :  { %v1898_v29 = vpop.f32.mrf.mxu1 }
 0x6ae   :  { %v894_v31 = vmul.f32 %v893_v28, %v885_v27  ;;  %v891_v42 = vadd.f32 %v890_v40, %v889_v41 }
 0x6b0   :  { %v895_v32 = vadd.f32 %v894_v31, %v892_v30  ;;  %v905_v43 = vmul.f32 0.05263158, %v891_v42  ;;  %v1096_v11 = vmul.f32 0.9, %v891_v42 }
 0x6b2   :  { %1954 = vrsqrt.f32 %v895_v32  ;;  %vm898_vm6 = vcmp.eq.f32.partialorder %v895_v32, inf  ;;  %v901_v35 = vand.u32 2147483648, %v895_v32  ;;  %vm900_vm7 = vcmp.eq.f32.partialorder %v895_v32, 0.0 }
 0x6b3   :  { %v1099_v0 = vmul.f32 0.999, %v895_v32 }
 0x6bf   :  { %v1955_v33 = vpop.eup %1954 }
 0x6c0   :  { %v897_v34 = vmul.f32 %v1955_v33, %v895_v32 }
 0x6c2   :  { %v899_v36 = vsel %vm898_vm6, %v895_v32, %v897_v34 }
 0x6c3   :  { %v902_v37 = vsel %vm900_vm7, %v901_v35, %v899_v36 }
 0x6c4   :  { %v903_v38 = vmul.f32 22.366272, %v902_v37 }
 0x6c6   :  { %v904_v39 = vadd.f32 1e-08, %v903_v38 }
 0x6c8   :  { %1956 = vrcp.f32 %v904_v39 }
 0x6d5   :  { %v1957_v44 = vpop.eup %1956 }
 0x6d6   :  { %v907_v45 = vmul.f32 %v1957_v44, %v905_v43 }
 0x6d8   :  { %v908_v46 = vsub.f32 %v701_v14, %v907_v45 }
 0x6da   :  { %1900 = vmatpush3.xpose.msk.msra.mxu0 %vm491_vm1, %v908_v46 }
 0x6db   :  { %1909 = vmatprep.subr.mxu0 %v2027_v16 }
 0x6dd   :  { %1902 = vmatmul.mubr.msk.f32.vlgmr.msra.gmra.mxu0 %vm491_vm1, %v2511_v48 }
 0x6de   :  { %1911 = vmatprep.mubr.msk.f32.mxu0 %vm2028_vm0, %v2027_v16 }
 0x79d   :  { %v978_v47 = vpop.f32.mrf.mxu0 }
 0x79e   :  { %v982_v49 = vmul.f32 1.442695, %v978_v47 }
 0x79f   :  { %v1903_v51 = vpop.f32.mrf.mxu0 }
 0x7a0   :  { %1958 = vpow2.f32 %v982_v49 }
 0x7ad   :  { %v1959_v52 = vpop.eup %1958 }
 0x7ae   :  { %v984_v53 = vsel %vm570_vm2, %v1959_v52, 0.0 }
 0x7af   :  { %985 = vadd.xlane.f32.xlu0 %v984_v53 }
 0x838   :  { %v986_v54 = vpop.xlane.xlu0 %985 }
 0x839   :  { %1960 = vrcp.f32 %v986_v54 }
 0x846   :  { %v1961_v55 = vpop.eup %1960 }
 0x847   :  { %v988_v56 = vmul.f32 %v1961_v55, %v1959_v52 }
 0x849   :  { %v989_v57 = vsub.f32 %v988_v56, %v2525_v58 }
 0x84b   :  { %v990_v59 = vmul.f32 0.125, %v989_v57 }
 0x84d   :  { %991 = vxpose.xlu1.b32.start.end [1/1] (short) (narrow) %v990_v59, 8 }
 0x8c9   :  { %v1007_v60 = vpop.trf.xlu1 }
 0x8ca   :  { %1907 = vmatmul.mubr.msk.f32.vlgmr.msra.gmra.mxu1 %vm610_vm3, %v1007_v60 }
 0x8cb   :  { %1915 = vmatpush3.msra.mxu1 %v2511_v48  ;;  %1916 = vmatprep.mubr.msk.f32.mxu1 %vm2028_vm0, %v2027_v16 }
 0x8cc   :  { %1924 = vmatprep.subr.mxu1 %v2027_v16 }
 0x98a   :  { %v1092_v61 = vpop.f32.mrf.mxu1 }
 0x98b   :  { %v1100_v62 = vmul.f32 0.001, %v1092_v61  ;;  %v1097_v10 = vmul.f32 0.1, %v1092_v61 }
 0x98c   :  { %v1908_v63 = vpop.f32.mrf.mxu1 }
 0x98d   :  { %v1101_v1 = vmul.f32 %v1100_v62, %v1092_v61  ;;  %v1098_v12 = vadd.f32 %v1097_v10, %v1096_v11 }
 0x98f   :  { %v1102_v2 = vadd.f32 %v1101_v1, %v1099_v0  ;;  %v1112_v13 = vmul.f32 0.036900368, %v1098_v12  ;;  %v1303_v43 = vmul.f32 0.9, %v1098_v12 }
 0x991   :  { %1962 = vrsqrt.f32 %v1102_v2  ;;  %vm1105_vm8 = vcmp.eq.f32.partialorder %v1102_v2, inf  ;;  %v1108_v5 = vand.u32 2147483648, %v1102_v2  ;;  %vm1107_vm9 = vcmp.eq.f32.partialorder %v1102_v2, 0.0 }
 0x992   :  { %v1306_v32 = vmul.f32 0.999, %v1102_v2 }
 0x99e   :  { %v1963_v3 = vpop.eup %1962 }
 0x99f   :  { %v1104_v4 = vmul.f32 %v1963_v3, %v1102_v2 }
 0x9a1   :  { %v1106_v6 = vsel %vm1105_vm8, %v1102_v2, %v1104_v4 }
 0x9a2   :  { %v1109_v7 = vsel %vm1107_vm9, %v1108_v5, %v1106_v6 }
 0x9a3   :  { %v1110_v8 = vmul.f32 18.266552, %v1109_v7 }
 0x9a5   :  { %v1111_v9 = vadd.f32 1e-08, %v1110_v8 }
 0x9a7   :  { %1964 = vrcp.f32 %v1111_v9 }
 0x9b4   :  { %v1965_v14 = vpop.eup %1964 }
 0x9b5   :  { %v1114_v15 = vmul.f32 %v1965_v14, %v1112_v13 }
 0x9b7   :  { %v1115_v17 = vsub.f32 %v908_v46, %v1114_v15 }
 0x9b9   :  { %1910 = vmatpush3.xpose.msk.msra.mxu0 %vm491_vm1, %v1115_v17 }
 0x9ba   :  { %1919 = vmatprep.subr.mxu0 %v2027_v16 }
 0x9bc   :  { %1912 = vmatmul.mubr.msk.f32.vlgmr.msra.gmra.mxu0 %vm491_vm1, %v2511_v48 }
 0x9bd   :  { %1921 = vmatprep.mubr.msk.f32.mxu0 %vm2028_vm0, %v2027_v16 }
 0xa7c   :  { %v1185_v18 = vpop.f32.mrf.mxu0 }
 0xa7d   :  { %v1189_v19 = vmul.f32 1.442695, %v1185_v18  ;;  %v1530_v18 = vld [vmem:[%s2594_s2] sm:$0xff]  ;;  %s1650_s2 = sld [smem:[#allocation2]] }
 0xa7e   :  { %v1913_v20 = vpop.f32.mrf.mxu0 }
 0xa7f   :  { %1966 = vpow2.f32 %v1189_v19 }
 0xa8c   :  { %v1967_v21 = vpop.eup %1966 }
 0xa8d   :  { %v1191_v22 = vsel %vm570_vm2, %v1967_v21, 0.0 }
 0xa8e   :  { %1192 = vadd.xlane.f32.xlu1 %v1191_v22 }
 0xb17   :  { %v1193_v23 = vpop.xlane.xlu1 %1192 }
 0xb18   :  { %1968 = vrcp.f32 %v1193_v23 }
 0xb25   :  { %v1969_v24 = vpop.eup %1968 }
 0xb26   :  { %v1195_v25 = vmul.f32 %v1969_v24, %v1967_v21 }
 0xb28   :  { %v1196_v26 = vsub.f32 %v1195_v25, %v2525_v58 }
 0xb2a   :  { %v1197_v27 = vmul.f32 0.125, %v1196_v26 }
 0xb2c   :  { %1198 = vxpose.xlu0.b32.start.end [1/1] (short) (narrow) %v1197_v27, 8 }
 0xba8   :  { %v1214_v28 = vpop.trf.xlu0 }
 0xba9   :  { %1917 = vmatmul.mubr.msk.f32.vlgmr.msra.gmra.mxu1 %vm610_vm3, %v1214_v28 }
 0xbaa   :  { %1925 = vmatpush3.msra.mxu1 %v2511_v48  ;;  %1926 = vmatprep.mubr.msk.f32.mxu1 %vm2028_vm0, %v2027_v16 }
 0xc69   :  { %v1299_v29 = vpop.f32.mrf.mxu1 }
 0xc6a   :  { %v1307_v30 = vmul.f32 0.001, %v1299_v29  ;;  %v1304_v42 = vmul.f32 0.1, %v1299_v29 }
 0xc6b   :  { %v1918_v31 = vpop.f32.mrf.mxu1 }
 0xc6c   :  { %v1308_v33 = vmul.f32 %v1307_v30, %v1299_v29  ;;  %v1305_v44 = vadd.f32 %v1304_v42, %v1303_v43 }
 0xc6e   :  { %v1309_v34 = vadd.f32 %v1308_v33, %v1306_v32  ;;  %v1319_v45 = vmul.f32 0.029078221, %v1305_v44  ;;  %v1510_v10 = vmul.f32 0.9, %v1305_v44 }
 0xc70   :  { %1970 = vrsqrt.f32 %v1309_v34  ;;  %vm1312_vm10 = vcmp.eq.f32.partialorder %v1309_v34, inf  ;;  %v1315_v37 = vand.u32 2147483648, %v1309_v34  ;;  %vm1314_vm11 = vcmp.eq.f32.partialorder %v1309_v34, 0.0 }
 0xc71   :  { %v1513_v0 = vmul.f32 0.999, %v1309_v34 }
 0xc7d   :  { %v1971_v35 = vpop.eup %1970 }
 0xc7e   :  { %v1311_v36 = vmul.f32 %v1971_v35, %v1309_v34 }
 0xc80   :  { %v1313_v38 = vsel %vm1312_vm10, %v1309_v34, %v1311_v36 }
 0xc81   :  { %v1316_v39 = vsel %vm1314_vm11, %v1315_v37, %v1313_v38 }
 0xc82   :  { %v1317_v40 = vmul.f32 15.823253, %v1316_v39 }
 0xc84   :  { %v1318_v41 = vadd.f32 1e-08, %v1317_v40 }
 0xc86   :  { %1972 = vrcp.f32 %v1318_v41 }
 0xc93   :  { %v1973_v46 = vpop.eup %1972 }
 0xc94   :  { %v1321_v47 = vmul.f32 %v1973_v46, %v1319_v45 }
 0xc96   :  { %v1322_v49 = vsub.f32 %v1115_v17, %v1321_v47  ;;  %v489_v17 = vmax.f32 %v2513_v50, 0.0 }
 0xc98   :  { %1920 = vmatpush3.xpose.msk.msra.mxu0 %vm491_vm1, %v1322_v49 }
 0xc99   :  { %1929 = vmatprep.subr.mxu0 %v2027_v16 }
 0xc9b   :  { %1922 = vmatmul.mubr.msk.f32.vlgmr.msra.gmra.mxu0 %vm491_vm1, %v2511_v48 }
 0xc9c   :  { %1931 = vmatprep.mubr.msk.f32.mxu0 %vm2028_vm0, %v2027_v16 }
 0xd5b   :  { %v1392_v51 = vpop.f32.mrf.mxu0 }
 0xd5c   :  { %v1396_v52 = vmul.f32 1.442695, %v1392_v51 }
 0xd5d   :  { %v1923_v53 = vpop.f32.mrf.mxu0 }
 0xd5e   :  { %1974 = vpow2.f32 %v1396_v52  ;;  %v1651_v53 = vstv %s1650_s2 }
 0xd6b   :  { %v1975_v54 = vpop.eup %1974 }
 0xd6c   :  { %v1398_v55 = vsel %vm570_vm2, %v1975_v54, 0.0 }
 0xd6d   :  { %1399 = vadd.xlane.f32.xlu1 %v1398_v55  ;;  %v1652_v55 = vmul.f32 1.442695, %v1651_v53 }
 0xdf6   :  { %v1400_v56 = vpop.xlane.xlu1 %1399 }
 0xdf7   :  { %1976 = vrcp.f32 %v1400_v56 }
 0xe04   :  { %v1977_v57 = vpop.eup %1976 }
 0xe05   :  { %v1402_v59 = vmul.f32 %v1977_v57, %v1975_v54  ;;  %v1655_v54 = vstv %s1704_s16  ;;  %v1661_v57 = vlaneseq }
 0xe06   :  { %v1656_v56 = vmul.f32 1.442695, %v1655_v54 }
 0xe07   :  { %v1403_v60 = vsub.f32 %v1402_v59, %v2525_v58 }
 0xe09   :  { %v1404_v61 = vmul.f32 0.125, %v1403_v60 }
 0xe0b   :  { %1405 = vxpose.xlu1.b32.start.end [1/1] (short) (narrow) %v1404_v61, 8 }
 0xe87   :  { %v1421_v48 = vpop.trf.xlu1 }
 0xe88   :  { %1927 = vmatmul.mubr.msk.f32.vlgmr.msra.gmra.mxu1 %vm610_vm3, %v1421_v48 }
 0xf48   :  { %v1506_v16 = vpop.f32.mrf.mxu1 }
 0xf49   :  { %v1514_v62 = vmul.f32 0.001, %v1506_v16  ;;  %v1511_v9 = vmul.f32 0.1, %v1506_v16 }
 0xf4a   :  { %v1928_v63 = vpop.f32.mrf.mxu1 }
 0xf4b   :  { %v1515_v1 = vmul.f32 %v1514_v62, %v1506_v16  ;;  %v1512_v11 = vadd.f32 %v1511_v9, %v1510_v10  ;;  %v1662_v16 = vand.u32 127, %v1661_v57 }
 0xf4d   :  { %v1516_v2 = vadd.f32 %v1515_v1, %v1513_v0  ;;  %v1526_v12 = vmul.f32 0.024419429, %v1512_v11  ;;  %vm1665_vm0 = vcmp.eq.s32.totalorder %v1662_v16, 1 }
 0xf4f   :  { %1978 = vrsqrt.f32 %v1516_v2  ;;  %vm1519_vm12 = vcmp.eq.f32.partialorder %v1516_v2, inf  ;;  %v1522_v5 = vand.u32 2147483648, %v1516_v2  ;;  %vm1521_vm13 = vcmp.eq.f32.partialorder %v1516_v2, 0.0 }
 0xf5c   :  { %v1979_v3 = vpop.eup %1978 }
 0xf5d   :  { %v1518_v4 = vmul.f32 %v1979_v3, %v1516_v2 }
 0xf5f   :  { %v1520_v6 = vsel %vm1519_vm12, %v1516_v2, %v1518_v4 }
 0xf60   :  { %v1523_v7 = vsel %vm1521_vm13, %v1522_v5, %v1520_v6 }
 0xf61   :  { %v1524_v58 = vmul.f32 14.156285, %v1523_v7 }
 0xf63   :  { %v1525_v8 = vadd.f32 1e-08, %v1524_v58 }
 0xf65   :  { %1980 = vrcp.f32 %v1525_v8 }
 0xf72   :  { %v1981_v13 = vpop.eup %1980 }
 0xf73   :  { %v1528_v14 = vmul.f32 %v1981_v13, %v1526_v12 }
 0xf75   :  { %v1529_v15 = vsub.f32 %v1322_v49, %v1528_v14 }
 0xf77   :  { %1930 = vmatpush3.xpose.msk.msra.mxu0 %vm491_vm1, %v1529_v15  ;;  %v1637_v35 = vand.u32 2147483647, %v1529_v15 }
 0xf79   :  { %v1639_v36 = vsel %vm1638_vm15, %v1637_v35, 0.0 }
 0xf7a   :  { %1932 = vmatmul.mubr.msk.f32.vlgmr.msra.gmra.mxu0 %vm491_vm1, %v489_v17  ;;  %vm1663_vm1 = vcmp.eq.s32.totalorder %v1662_v16, 0 }
0x103a   :  { %v1603_v19 = vpop.f32.mrf.mxu0 }
0x103b   :  { %v1607_v20 = vsel %vm570_vm2, %v1603_v19, -inf  ;;  %v1619_v21 = vmul.f32 %v1603_v19, %v1530_v18 }
0x103c   :  { %1608 = vmax.xlane.f32.xlu0 %v1607_v20  ;;  %v1933_v22 = vpop.f32.mrf.mxu0 }
0x103d   :  { %v1620_v23 = vsel %vm570_vm2, %v1619_v21, 0.0 }
0x1040   :  { %1621 = vadd.xlane.f32.xlu0 %v1620_v23 }
0x10c5   :  { %v1609_v24 = vpop.xlane.xlu0 %1608 }
0x10c6   :  { %v1610_v25 = vsub.f32 %v1603_v19, %v1609_v24 }
0x10c8   :  { %v1611_v26 = vmul.f32 1.442695, %v1610_v25 }
0x10c9   :  { %v1622_v32 = vpop.xlane.xlu0 %1621 }
0x10ca   :  { %1982 = vpow2.f32 %v1611_v26 }
0x10d7   :  { %v1983_v50 = vpop.eup %1982 }
0x10d8   :  { %v1613_v27 = vsel %vm570_vm2, %v1983_v50, 0.0  ;;  %vm1668_vm2 = vcmp.eq.s32.totalorder %v1662_v16, 2 }
0x10d9   :  { %1614 = vadd.xlane.f32.xlu1 %v1613_v27 }
0x1162   :  { %v1615_v28 = vpop.xlane.xlu1 %1614 }
0x1163   :  { %1984 = vlog2.f32 %v1615_v28 }
0x1164   :  { %1986 = vpow2.f32 %v1652_v55 }
0x1165   :  { %1988 = vpow2.f32 %v1656_v56 }
0x1170   :  { %v1985_v29 = vpop.eup %1984 }
0x1171   :  { %v1617_v30 = vmul.f32 0.6931472, %v1985_v29  ;;  %v1987_v60 = vpop.eup %1986 }
0x1172   :  { %v1989_v48 = vpop.eup %1988 }
0x1173   :  { %v1618_v31 = vadd.f32 %v1617_v30, %v1609_v24 }
0x1175   :  { %v1623_v33 = vsub.f32 %v1618_v31, %v1622_v32 }
0x1177   :  { %v1625_v34 = vsel %vm1624_vm14, %v1623_v33, 0.0 }
0x1178   :  { %1626 = vadd.xlane.f32.xlu0 %v1625_v34 }
0x117c   :  { %1640 = vadd.xlane.f32.xlu0 %v1639_v36 }
0x1201   :  { %v1627_v37 = vpop.xlane.xlu0 %1626 }
0x1202   :  { %v1628_v38 = vrot.slane %v1627_v37, 4 }
0x1204   :  { %v1629_v39 = vadd.f32 %v1628_v38, %v1627_v37 }
0x1205   :  { %v1641_v40 = vpop.xlane.xlu0 %1640 }
0x1206   :  { %v1630_v41 = vrot.slane %v1629_v39, 2  ;;  %v1642_v42 = vrot.slane %v1641_v40, 4 }
0x1208   :  { %v1643_v43 = vadd.f32 %v1642_v42, %v1641_v40  ;;  %v1631_v44 = vadd.f32 %v1630_v41, %v1629_v39 }
0x120a   :  { %v1644_v45 = vrot.slane %v1643_v43, 2  ;;  %v1632_v46 = vrot.slane %v1631_v44, 1 }
0x120c   :  { %v1645_v47 = vadd.f32 %v1644_v45, %v1643_v43  ;;  %v1633_v49 = vadd.f32 %v1632_v46, %v1631_v44 }
0x120e   :  { %1934 = vpush %v1633_v49  ;;  %v1646_v51 = vrot.slane %v1645_v47, 1 }
0x1210   :  { %v1647_v52 = vadd.f32 %v1646_v51, %v1645_v47 }
0x1212   :  { %1936 = vpush %v1647_v52 }
0x123f   :  { %s1935_s17 = spop %1934 }
0x1240   :  { %v1635_v59 = vstv %s1935_s17 }
0x1241   :  { %v1636_v61 = vmul.f32 0.125, %v1635_v59 }
0x1243   :  { %s1937_s18 = spop %1936  ;;  %v1659_v63 = vmul.f32 %v1987_v60, %v1636_v61  ;;  %v1666_v2 = vsel %vm1665_vm0, %v1636_v61, 0.0 }
0x1244   :  { %v1649_v62 = vstv %s1937_s18 }
0x1245   :  { %v1658_v0 = vmul.f32 %v1989_v48, %v1649_v62 }
0x1247   :  { %v1660_v1 = vadd.f32 %v1659_v63, %v1658_v0  ;;  %v1669_v5 = vsel %vm1668_vm2, %v1658_v0, 0.0 }
0x1249   :  { %v1664_v3 = vsel %vm1663_vm1, %v1660_v1, 0.0 }
0x124a   :  { %v1667_v4 = vadd.f32 %v1666_v2, %v1664_v3 }
0x124c   :  { %v1670_v6 = vadd.f32 %v1669_v5, %v1667_v4 }
0x124e   :  { %1671 = vst [vmem:[#allocation5] sm:$0x1] %v1670_v6 }
0x124f   :  { %2013 = shalt.err (!%p2010_p9)
}
0x1250   :  { %1681 = dma.vmem_to_hbm [thread:$0]  %s1679_s20, 16, %s2598_s6, [#allocation3]  }
0x1251   :  { %2024 = dma.done.wait [#allocation3], 16  }
0x1252   :  { %2025 = vsyncadd [#allocation3], 4294967280 }
0x1253   :  { %1685 = vsyncpa [#allocation3], 1 }
0x1254   :  { %1686 = vsyncpa [#allocation4], 1 }

</bundles_post_ra>
